<compile_context>
chip_gen: v5e
topology: v5e:2x2
jax: 0.10.0
libtpu: 0.0.40
codegen_flags: <defaults>
</compile_context>

<pallas_src>
import functools

import jax
import jax.numpy as jnp
from jax.experimental import pallas as pl
from jax.experimental.pallas import tpu as pltpu


# ----------------------------------------------------------------------------
# Fused SHRED kernel: 2-layer LSTM recurrence + MLP decoder.
# ----------------------------------------------------------------------------
def _shred_fused_kernel(x2d_ref, wih1_ref, b1_ref, rhs_rec_ref, b2_ref,
                        w1_ref, bd1_ref, w2_ref, bd2_ref,
                        w3_ref, bd3_ref,
                        out_ref,
                        z2_ref,
                        *, lags, batch, hidden):
    B, H = batch, hidden

    # LSTM recurrence + first two MLP layers: computed once (column-block 0)
    # and cached in VMEM scratch; every output-column block reuses z2.
    @pl.when(pl.program_id(0) == 0)
    def _():
        # Hoisted layer-1 input projection: ONE MXU op for all timesteps.
        xproj = (jnp.dot(x2d_ref[...], wih1_ref[...],
                         preferred_element_type=jnp.float32) + b1_ref[...])

        # Hoisted bias broadcast (JAX does not CSE broadcast_in_dim; inside
        # the unrolled loop this would emit `lags` broadcasts on the VALU).
        b2b = jnp.broadcast_to(b2_ref[...], (B, 4 * H))

        def lstm_cell(gates, c_prev):
            # PyTorch LSTM gate order: i, f, g, o.  At these shapes B*4H is a
            # single vreg, so full-width sigmoid + tanh is one EUP op each.
            # TODO(synk): at production B/H apply sigmoid/tanh per gate and
            # choose H a multiple of 128 so gate slices are lane-aligned.
            sig = jax.nn.sigmoid(gates)
            th = jnp.tanh(gates)
            i_g = sig[:, 0 * H:1 * H]
            f_g = sig[:, 1 * H:2 * H]
            g_g = th[:, 2 * H:3 * H]
            o_g = sig[:, 3 * H:4 * H]
            c_new = f_g * c_prev + i_g * g_g
            h_new = o_g * jnp.tanh(c_new)
            return h_new, c_new

        zeros = jnp.zeros((B, H), jnp.float32)

        # Software-pipelined recurrence: one fused (B,2H)x(2H,8H) MXU push per
        # step.  rhs_rec = [[Whh1, Wih2], [0, Whh2]]:
        #   res[:, :4H]  = h1(t) @ Whh1                 -> layer-1 gates at t+1
        #   res[:, 4H:]  = h1(t) @ Wih2 + h2(t-1)@Whh2  -> layer-2 gates at t
        # Prologue: h1(-1)=0  =>  gates1(0) = xproj[0].
        h1, c1 = lstm_cell(xproj[0:B, :], zeros)
        h2, c2 = zeros, zeros
        for t in range(lags):
            lhs = jnp.concatenate([h1, h2], axis=1)                   # (B, 2H)
            # Re-read fused weights from VMEM each step (vld slot has slack)
            # instead of pinning them live across the whole unrolled block.
            res = jnp.dot(lhs, rhs_rec_ref[...],
                          preferred_element_type=jnp.float32)         # (B, 8H)
            h2, c2 = lstm_cell(res[:, 4 * H:8 * H] + b2b, c2)         # layer-2, t
            if t + 1 < lags:                                          # layer-1, t+1
                gates1 = xproj[(t + 1) * B:(t + 2) * B, :] + res[:, 0:4 * H]
                h1, c1 = lstm_cell(gates1, c1)

        # First two MLP decoder layers (dropout = identity in eval mode).
        z1 = jnp.maximum(
            jnp.dot(h2, w1_ref[...], preferred_element_type=jnp.float32)
            + bd1_ref[...], 0.0)
        z2_ref[...] = jnp.maximum(
            jnp.dot(z1, w2_ref[...], preferred_element_type=jnp.float32)
            + bd2_ref[...], 0.0)

    # Final Linear over this lane-dense output-column block.
    out_ref[...] = (
        jnp.dot(z2_ref[...], w3_ref[...], preferred_element_type=jnp.float32)
        + bd3_ref[...]).astype(out_ref.dtype)


# ----------------------------------------------------------------------------
# Parameter construction (deterministic, PyTorch-style uniform init).
# ----------------------------------------------------------------------------
def init_shred_params(key, input_size, hidden_size, num_layers,
                      mlp_hidden, output_size):
    params = {"lstm": [], "mlp": []}
    H = hidden_size
    k_lstm = 1.0 / jnp.sqrt(jnp.float32(H))

    for layer in range(num_layers):
        in_dim = input_size if layer == 0 else H
        key, k1, k2, k3, k4 = jax.random.split(key, 5)
        wih = jax.random.uniform(k1, (4 * H, in_dim), jnp.float32, -k_lstm, k_lstm)
        whh = jax.random.uniform(k2, (4 * H, H), jnp.float32, -k_lstm, k_lstm)
        bih = jax.random.uniform(k3, (4 * H,), jnp.float32, -k_lstm, k_lstm)
        bhh = jax.random.uniform(k4, (4 * H,), jnp.float32, -k_lstm, k_lstm)
        params["lstm"].append({
            "wih_t": wih.T,                       # (in_dim, 4H)
            "whh_t": whh.T,                       # (H, 4H)
            "b": (bih + bhh).reshape(1, 4 * H),   # (1, 4H)
        })

    dims = [H] + list(mlp_hidden) + [output_size]
    for i in range(len(dims) - 1):
        key, k1, k2 = jax.random.split(key, 3)
        bound = 1.0 / jnp.sqrt(jnp.float32(dims[i]))
        w = jax.random.uniform(k1, (dims[i], dims[i + 1]), jnp.float32, -bound, bound)
        b = jax.random.uniform(k2, (1, dims[i + 1]), jnp.float32, -bound, bound)
        params["mlp"].append({"w": w, "b": b})
    return params


def _output_block(out_dim):
    """Lane-dense output-column block size (multiple of 128 when possible)."""
    if out_dim % 128 == 0:
        for bn in (512, 256, 128):
            if out_dim % bn == 0:
                return bn
    return out_dim


# ----------------------------------------------------------------------------
# SHRED forward (sindy=False path): sequence model -> decoder, fully fused.
# ----------------------------------------------------------------------------
@jax.jit
def shred_forward(params, x):
    """x: (batch, lags, n_sensors) -> (batch, output_size)."""
    B, lags, I = x.shape
    l1, l2 = params["lstm"]
    H = l1["whh_t"].shape[0]
    m = params["mlp"]
    M1 = m[0]["w"].shape[1]
    M2 = m[1]["w"].shape[1]
    out_dim = m[2]["w"].shape[1]

    # Pad batch to a multiple of 8 so every per-timestep row slice in the
    # kernel lands on an (8,128) sublane-tile boundary (no per-step relayout
    # on the serial recurrence).  Padded rows are zeros and sliced off below.
    Bp = max(8, ((B + 7) // 8) * 8)
    x_p = jnp.pad(x.astype(jnp.float32), ((0, Bp - B), (0, 0), (0, 0)))
    # Time-major, timesteps flattened into rows for the hoisted input projection.
    x2d = jnp.transpose(x_p, (1, 0, 2)).reshape(lags * Bp, I)

    # Fused recurrent weight block [[Whh1, Wih2], [0, Whh2]] -> (2H, 8H),
    # built once per parameter set (off the kernel's critical path).
    rhs_rec = jnp.concatenate([
        jnp.concatenate([l1["whh_t"], l2["wih_t"]], axis=1),
        jnp.concatenate([jnp.zeros((H, 4 * H), jnp.float32), l2["whh_t"]], axis=1),
    ], axis=0)

    BN = _output_block(out_dim)
    grid = (out_dim // BN,)

    kernel = functools.partial(_shred_fused_kernel, lags=lags, batch=Bp, hidden=H)

    def full(shape):
        return pl.BlockSpec(shape, lambda j: (0,) * len(shape))

    flops = 2 * (lags * Bp * I * 4 * H            # hoisted input projection
                 + lags * Bp * 2 * H * 8 * H      # fused recurrence matmuls
                 + Bp * (H * M1 + M1 * M2 + M2 * out_dim))
    bytes_accessed = 4 * (x2d.size + l1["wih_t"].size + rhs_rec.size
                          + m[0]["w"].size + m[1]["w"].size + m[2]["w"].size
                          + Bp * out_dim)
    cost = pl.CostEstimate(flops=flops,
                           transcendentals=6 * lags * Bp * 4 * H,
                           bytes_accessed=bytes_accessed)

    out_p = pl.pallas_call(
        kernel,
        out_shape=jax.ShapeDtypeStruct((Bp, out_dim), jnp.float32),
        grid_spec=pltpu.PrefetchScalarGridSpec(
            num_scalar_prefetch=0,
            grid=grid,
            in_specs=[
                full((lags * Bp, I)),                       # x2d
                full((I, 4 * H)),                           # Wih1^T
                full((1, 4 * H)),                           # b1 (bih1+bhh1)
                full((2 * H, 8 * H)),                       # fused [[Whh1,Wih2],[0,Whh2]]
                full((1, 4 * H)),                           # b2 (bih2+bhh2)
                full((H, M1)),                              # decoder W1
                full((1, M1)),                              # decoder b1
                full((M1, M2)),                             # decoder W2
                full((1, M2)),                              # decoder b2
                pl.BlockSpec((M2, BN), lambda j: (0, j)),   # decoder W3 column block
                pl.BlockSpec((1, BN), lambda j: (0, j)),    # decoder b3 column block
            ],
            out_specs=pl.BlockSpec((Bp, BN), lambda j: (0, j)),
            scratch_shapes=[pltpu.VMEM((Bp, M2), jnp.float32)],   # cached z2
        ),
        compiler_params=pltpu.CompilerParams(
            # "arbitrary": column blocks reuse the z2 scratch computed at block 0.
            # TODO(synk): on v7x, recompute the cheap LSTM/z1/z2 per core and mark
            # this axis "parallel" to shard the decoder blocks across both TCs.
            dimension_semantics=("arbitrary",),
        ),
        cost_estimate=cost,
    )(x2d,
      l1["wih_t"], l1["b"], rhs_rec, l2["b"],
      m[0]["w"], m[0]["b"], m[1]["w"], m[1]["b"], m[2]["w"], m[2]["b"])

    return out_p[:B]


# ----------------------------------------------------------------------------
# Pure-JAX reference for correctness check.
# ----------------------------------------------------------------------------
def shred_forward_ref(params, x):
    seq = jnp.transpose(x, (1, 0, 2)).astype(jnp.float32)

    for lp in params["lstm"]:
        B = seq.shape[1]
        H = lp["whh_t"].shape[0]

        def step(carry, x_t, lp=lp, H=H):
            h, c = carry
            gates = x_t @ lp["wih_t"] + h @ lp["whh_t"] + lp["b"]
            i_g = jax.nn.sigmoid(gates[:, 0 * H:1 * H])
            f_g = jax.nn.sigmoid(gates[:, 1 * H:2 * H])
            g_g = jnp.tanh(gates[:, 2 * H:3 * H])
            o_g = jax.nn.sigmoid(gates[:, 3 * H:4 * H])
            c = f_g * c + i_g * g_g
            h = o_g * jnp.tanh(c)
            return (h, c), h

        init = (jnp.zeros((B, H), jnp.float32), jnp.zeros((B, H), jnp.float32))
        _, seq = jax.lax.scan(step, init, seq)

    h_out = seq[-1]
    m = params["mlp"]
    z1 = jnp.maximum(h_out @ m[0]["w"] + m[0]["b"], 0.0)
    z2 = jnp.maximum(z1 @ m[1]["w"] + m[1]["b"], 0.0)
    return z2 @ m[2]["w"] + m[2]["b"]


if __name__ == "__main__":
    # Small shapes consistent with SHRED: x is (batch, lags, n_sensors).
    batch, lags, n_sensors = 2, 8, 4
    hidden_size, num_layers = 32, 2          # LSTM sequence model
    mlp_hidden = (64, 64)                    # MLP decoder hidden layers
    output_size = 128                        # full-state reconstruction size

    key = jax.random.PRNGKey(0)
    key, kx, kp = jax.random.split(key, 3)
    x = jax.random.normal(kx, (batch, lags, n_sensors), jnp.float32)
    params = init_shred_params(kp, n_sensors, hidden_size, num_layers,
                               mlp_hidden, output_size)

    out = shred_forward(params, x)
    out = jax.block_until_ready(out)

    # Full-f32 reference (explicit highest matmul precision so the XLA ref and
    # the Pallas MXU path are compared at matching accuracy).
    with jax.default_matmul_precision("highest"):
        ref = shred_forward_ref(params, x)
    ref = jax.block_until_ready(ref)

    assert out.shape == (batch, output_size)
    assert jnp.allclose(out, ref, atol=1e-3, rtol=1e-3), (
        f"mismatch vs reference: max abs diff = {jnp.max(jnp.abs(out - ref))}")

    print("KERNEL_OK")
</pallas_src>

<mosaic_0001>
module attributes {stable_mosaic.version = 11 : i64} {
  func.func @_shred_fused_kernel(%arg0: i32, %arg1: memref<64x4xf32, #tpu.memory_space<vmem>>, %arg2: memref<4x128xf32, #tpu.memory_space<vmem>>, %arg3: memref<1x128xf32, #tpu.memory_space<vmem>>, %arg4: memref<64x256xf32, #tpu.memory_space<vmem>>, %arg5: memref<1x128xf32, #tpu.memory_space<vmem>>, %arg6: memref<32x64xf32, #tpu.memory_space<vmem>>, %arg7: memref<1x64xf32, #tpu.memory_space<vmem>>, %arg8: memref<64x64xf32, #tpu.memory_space<vmem>>, %arg9: memref<1x64xf32, #tpu.memory_space<vmem>>, %arg10: memref<64x128xf32, #tpu.memory_space<vmem>>, %arg11: memref<1x128xf32, #tpu.memory_space<vmem>>, %arg12: memref<8x128xf32, #tpu.memory_space<vmem>>, %arg13: memref<8x64xf32, #tpu.memory_space<vmem>>) attributes {dimension_semantics = [#tpu.dimension_semantics<arbitrary>], iteration_bounds = array<i64: 1>, scalar_prefetch = 0 : i64, scratch_operands = 1 : i64, tpu.core_type = #tpu.core_type<tc>, window_params = [{pipeline_mode = #tpu.pipeline_mode<synchronous>, transform_indices = @transform_0, window_bounds = array<i64: 64, 4>}, {pipeline_mode = #tpu.pipeline_mode<synchronous>, transform_indices = @transform_1, window_bounds = array<i64: 4, 128>}, {pipeline_mode = #tpu.pipeline_mode<synchronous>, transform_indices = @transform_2, window_bounds = array<i64: 1, 128>}, {pipeline_mode = #tpu.pipeline_mode<synchronous>, transform_indices = @transform_3, window_bounds = array<i64: 64, 256>}, {pipeline_mode = #tpu.pipeline_mode<synchronous>, transform_indices = @transform_4, window_bounds = array<i64: 1, 128>}, {pipeline_mode = #tpu.pipeline_mode<synchronous>, transform_indices = @transform_5, window_bounds = array<i64: 32, 64>}, {pipeline_mode = #tpu.pipeline_mode<synchronous>, transform_indices = @transform_6, window_bounds = array<i64: 1, 64>}, {pipeline_mode = #tpu.pipeline_mode<synchronous>, transform_indices = @transform_7, window_bounds = array<i64: 64, 64>}, {pipeline_mode = #tpu.pipeline_mode<synchronous>, transform_indices = @transform_8, window_bounds = array<i64: 1, 64>}, {transform_indices = @transform_9, window_bounds = array<i64: 64, 128>}, {transform_indices = @transform_10, window_bounds = array<i64: 1, 128>}, {transform_indices = @transform_11, window_bounds = array<i64: 8, 128>}]} {
    %c0_i32 = arith.constant 0 : i32
    %0 = arith.cmpi eq, %arg0, %c0_i32 : i32
    %1 = arith.extui %0 : i1 to i32
    %c0_i32_0 = arith.constant 0 : i32
    %2 = arith.cmpi ne, %1, %c0_i32_0 : i32
    scf.if %2 {
      %c0_8 = arith.constant 0 : index
      %c0_9 = arith.constant 0 : index
      %10 = vector.load %arg1[%c0_8, %c0_9] : memref<64x4xf32, #tpu.memory_space<vmem>>, vector<64x4xf32>
      %c0_10 = arith.constant 0 : index
      %c0_11 = arith.constant 0 : index
      %11 = vector.load %arg2[%c0_10, %c0_11] : memref<4x128xf32, #tpu.memory_space<vmem>>, vector<4x128xf32>
      %cst_12 = arith.constant dense<0.000000e+00> : vector<64x128xf32>
      %12 = tpu.matmul %10, %11, %cst_12 {dimension_numbers = #tpu.dot_dimension_numbers<[1], [0], [0], [1], [0, 0, 1, 1], [], []>} : vector<64x4xf32>, vector<4x128xf32>, vector<64x128xf32> -> vector<64x128xf32>
      %c0_13 = arith.constant 0 : index
      %c0_14 = arith.constant 0 : index
      %13 = vector.load %arg3[%c0_13, %c0_14] : memref<1x128xf32, #tpu.memory_space<vmem>>, vector<1x128xf32>
      %14 = vector.broadcast %13 : vector<1x128xf32> to vector<64x128xf32>
      %15 = arith.addf %12, %14 : vector<64x128xf32>
      %c0_15 = arith.constant 0 : index
      %c0_16 = arith.constant 0 : index
      %16 = vector.load %arg5[%c0_15, %c0_16] : memref<1x128xf32, #tpu.memory_space<vmem>>, vector<1x128xf32>
      %17 = vector.shape_cast %16 : vector<1x128xf32> to vector<1x128xf32>
      %18 = vector.broadcast %17 : vector<1x128xf32> to vector<8x128xf32>
      %cst_17 = arith.constant 0.000000e+00 : f32
      %19 = vector.broadcast %cst_17 : f32 to vector<8x32xf32>
      %20 = vector.extract_strided_slice %15 {offsets = [0, 0], sizes = [8, 128], strides = [1, 1]} : vector<64x128xf32> to vector<8x128xf32>
      %21 = arith.negf %20 : vector<8x128xf32>
      %22 = math.exp %21 : vector<8x128xf32>
      %cst_18 = arith.constant 1.000000e+00 : f32
      %23 = vector.broadcast %cst_18 : f32 to vector<8x128xf32>
      %24 = arith.addf %23, %22 : vector<8x128xf32>
      %25 = arith.divf %23, %24 : vector<8x128xf32>
      %26 = math.tanh %20 : vector<8x128xf32>
      %27 = vector.extract_strided_slice %25 {offsets = [0, 0], sizes = [8, 32], strides = [1, 1]} : vector<8x128xf32> to vector<8x32xf32>
      %28 = vector.extract_strided_slice %25 {offsets = [0, 32], sizes = [8, 32], strides = [1, 1]} : vector<8x128xf32> to vector<8x32xf32>
      %29 = vector.extract_strided_slice %26 {offsets = [0, 64], sizes = [8, 32], strides = [1, 1]} : vector<8x128xf32> to vector<8x32xf32>
      %30 = vector.extract_strided_slice %25 {offsets = [0, 96], sizes = [8, 32], strides = [1, 1]} : vector<8x128xf32> to vector<8x32xf32>
      %31 = arith.mulf %28, %19 : vector<8x32xf32>
      %32 = arith.mulf %27, %29 : vector<8x32xf32>
      %33 = arith.addf %31, %32 : vector<8x32xf32>
      %34 = math.tanh %33 : vector<8x32xf32>
      %35 = arith.mulf %30, %34 : vector<8x32xf32>
      %36 = tpu.concatenate %35, %19 in 1 : vector<8x32xf32>, vector<8x32xf32> -> vector<8x64xf32>
      %c0_19 = arith.constant 0 : index
      %c0_20 = arith.constant 0 : index
      %37 = vector.load %arg4[%c0_19, %c0_20] : memref<64x256xf32, #tpu.memory_space<vmem>>, vector<64x256xf32>
      %cst_21 = arith.constant dense<0.000000e+00> : vector<8x256xf32>
      %38 = tpu.matmul %36, %37, %cst_21 {dimension_numbers = #tpu.dot_dimension_numbers<[1], [0], [0], [1], [0, 0, 1, 1], [], []>} : vector<8x64xf32>, vector<64x256xf32>, vector<8x256xf32> -> vector<8x256xf32>
      %39 = vector.extract_strided_slice %38 {offsets = [0, 128], sizes = [8, 128], strides = [1, 1]} : vector<8x256xf32> to vector<8x128xf32>
      %40 = arith.addf %39, %18 : vector<8x128xf32>
      %41 = arith.negf %40 : vector<8x128xf32>
      %42 = math.exp %41 : vector<8x128xf32>
      %cst_22 = arith.constant 1.000000e+00 : f32
      %43 = vector.broadcast %cst_22 : f32 to vector<8x128xf32>
      %44 = arith.addf %43, %42 : vector<8x128xf32>
      %45 = arith.divf %43, %44 : vector<8x128xf32>
      %46 = math.tanh %40 : vector<8x128xf32>
      %47 = vector.extract_strided_slice %45 {offsets = [0, 0], sizes = [8, 32], strides = [1, 1]} : vector<8x128xf32> to vector<8x32xf32>
      %48 = vector.extract_strided_slice %45 {offsets = [0, 32], sizes = [8, 32], strides = [1, 1]} : vector<8x128xf32> to vector<8x32xf32>
      %49 = vector.extract_strided_slice %46 {offsets = [0, 64], sizes = [8, 32], strides = [1, 1]} : vector<8x128xf32> to vector<8x32xf32>
      %50 = vector.extract_strided_slice %45 {offsets = [0, 96], sizes = [8, 32], strides = [1, 1]} : vector<8x128xf32> to vector<8x32xf32>
      %51 = arith.mulf %48, %19 : vector<8x32xf32>
      %52 = arith.mulf %47, %49 : vector<8x32xf32>
      %53 = arith.addf %51, %52 : vector<8x32xf32>
      %54 = math.tanh %53 : vector<8x32xf32>
      %55 = arith.mulf %50, %54 : vector<8x32xf32>
      %56 = vector.extract_strided_slice %15 {offsets = [8, 0], sizes = [8, 128], strides = [1, 1]} : vector<64x128xf32> to vector<8x128xf32>
      %57 = vector.extract_strided_slice %38 {offsets = [0, 0], sizes = [8, 128], strides = [1, 1]} : vector<8x256xf32> to vector<8x128xf32>
      %58 = arith.addf %56, %57 : vector<8x128xf32>
      %59 = arith.negf %58 : vector<8x128xf32>
      %60 = math.exp %59 : vector<8x128xf32>
      %cst_23 = arith.constant 1.000000e+00 : f32
      %61 = vector.broadcast %cst_23 : f32 to vector<8x128xf32>
      %62 = arith.addf %61, %60 : vector<8x128xf32>
      %63 = arith.divf %61, %62 : vector<8x128xf32>
      %64 = math.tanh %58 : vector<8x128xf32>
      %65 = vector.extract_strided_slice %63 {offsets = [0, 0], sizes = [8, 32], strides = [1, 1]} : vector<8x128xf32> to vector<8x32xf32>
      %66 = vector.extract_strided_slice %63 {offsets = [0, 32], sizes = [8, 32], strides = [1, 1]} : vector<8x128xf32> to vector<8x32xf32>
      %67 = vector.extract_strided_slice %64 {offsets = [0, 64], sizes = [8, 32], strides = [1, 1]} : vector<8x128xf32> to vector<8x32xf32>
      %68 = vector.extract_strided_slice %63 {offsets = [0, 96], sizes = [8, 32], strides = [1, 1]} : vector<8x128xf32> to vector<8x32xf32>
      %69 = arith.mulf %66, %33 : vector<8x32xf32>
      %70 = arith.mulf %65, %67 : vector<8x32xf32>
      %71 = arith.addf %69, %70 : vector<8x32xf32>
      %72 = math.tanh %71 : vector<8x32xf32>
      %73 = arith.mulf %68, %72 : vector<8x32xf32>
      %74 = tpu.concatenate %73, %55 in 1 : vector<8x32xf32>, vector<8x32xf32> -> vector<8x64xf32>
      %c0_24 = arith.constant 0 : index
      %c0_25 = arith.constant 0 : index
      %75 = vector.load %arg4[%c0_24, %c0_25] : memref<64x256xf32, #tpu.memory_space<vmem>>, vector<64x256xf32>
      %cst_26 = arith.constant dense<0.000000e+00> : vector<8x256xf32>
      %76 = tpu.matmul %74, %75, %cst_26 {dimension_numbers = #tpu.dot_dimension_numbers<[1], [0], [0], [1], [0, 0, 1, 1], [], []>} : vector<8x64xf32>, vector<64x256xf32>, vector<8x256xf32> -> vector<8x256xf32>
      %77 = vector.extract_strided_slice %76 {offsets = [0, 128], sizes = [8, 128], strides = [1, 1]} : vector<8x256xf32> to vector<8x128xf32>
      %78 = arith.addf %77, %18 : vector<8x128xf32>
      %79 = arith.negf %78 : vector<8x128xf32>
      %80 = math.exp %79 : vector<8x128xf32>
      %cst_27 = arith.constant 1.000000e+00 : f32
      %81 = vector.broadcast %cst_27 : f32 to vector<8x128xf32>
      %82 = arith.addf %81, %80 : vector<8x128xf32>
      %83 = arith.divf %81, %82 : vector<8x128xf32>
      %84 = math.tanh %78 : vector<8x128xf32>
      %85 = vector.extract_strided_slice %83 {offsets = [0, 0], sizes = [8, 32], strides = [1, 1]} : vector<8x128xf32> to vector<8x32xf32>
      %86 = vector.extract_strided_slice %83 {offsets = [0, 32], sizes = [8, 32], strides = [1, 1]} : vector<8x128xf32> to vector<8x32xf32>
      %87 = vector.extract_strided_slice %84 {offsets = [0, 64], sizes = [8, 32], strides = [1, 1]} : vector<8x128xf32> to vector<8x32xf32>
      %88 = vector.extract_strided_slice %83 {offsets = [0, 96], sizes = [8, 32], strides = [1, 1]} : vector<8x128xf32> to vector<8x32xf32>
      %89 = arith.mulf %86, %53 : vector<8x32xf32>
      %90 = arith.mulf %85, %87 : vector<8x32xf32>
      %91 = arith.addf %89, %90 : vector<8x32xf32>
      %92 = math.tanh %91 : vector<8x32xf32>
      %93 = arith.mulf %88, %92 : vector<8x32xf32>
      %94 = vector.extract_strided_slice %15 {offsets = [16, 0], sizes = [8, 128], strides = [1, 1]} : vector<64x128xf32> to vector<8x128xf32>
      %95 = vector.extract_strided_slice %76 {offsets = [0, 0], sizes = [8, 128], strides = [1, 1]} : vector<8x256xf32> to vector<8x128xf32>
      %96 = arith.addf %94, %95 : vector<8x128xf32>
      %97 = arith.negf %96 : vector<8x128xf32>
      %98 = math.exp %97 : vector<8x128xf32>
      %cst_28 = arith.constant 1.000000e+00 : f32
      %99 = vector.broadcast %cst_28 : f32 to vector<8x128xf32>
      %100 = arith.addf %99, %98 : vector<8x128xf32>
      %101 = arith.divf %99, %100 : vector<8x128xf32>
      %102 = math.tanh %96 : vector<8x128xf32>
      %103 = vector.extract_strided_slice %101 {offsets = [0, 0], sizes = [8, 32], strides = [1, 1]} : vector<8x128xf32> to vector<8x32xf32>
      %104 = vector.extract_strided_slice %101 {offsets = [0, 32], sizes = [8, 32], strides = [1, 1]} : vector<8x128xf32> to vector<8x32xf32>
      %105 = vector.extract_strided_slice %102 {offsets = [0, 64], sizes = [8, 32], strides = [1, 1]} : vector<8x128xf32> to vector<8x32xf32>
      %106 = vector.extract_strided_slice %101 {offsets = [0, 96], sizes = [8, 32], strides = [1, 1]} : vector<8x128xf32> to vector<8x32xf32>
      %107 = arith.mulf %104, %71 : vector<8x32xf32>
      %108 = arith.mulf %103, %105 : vector<8x32xf32>
      %109 = arith.addf %107, %108 : vector<8x32xf32>
      %110 = math.tanh %109 : vector<8x32xf32>
      %111 = arith.mulf %106, %110 : vector<8x32xf32>
      %112 = tpu.concatenate %111, %93 in 1 : vector<8x32xf32>, vector<8x32xf32> -> vector<8x64xf32>
      %c0_29 = arith.constant 0 : index
      %c0_30 = arith.constant 0 : index
      %113 = vector.load %arg4[%c0_29, %c0_30] : memref<64x256xf32, #tpu.memory_space<vmem>>, vector<64x256xf32>
      %cst_31 = arith.constant dense<0.000000e+00> : vector<8x256xf32>
      %114 = tpu.matmul %112, %113, %cst_31 {dimension_numbers = #tpu.dot_dimension_numbers<[1], [0], [0], [1], [0, 0, 1, 1], [], []>} : vector<8x64xf32>, vector<64x256xf32>, vector<8x256xf32> -> vector<8x256xf32>
      %115 = vector.extract_strided_slice %114 {offsets = [0, 128], sizes = [8, 128], strides = [1, 1]} : vector<8x256xf32> to vector<8x128xf32>
      %116 = arith.addf %115, %18 : vector<8x128xf32>
      %117 = arith.negf %116 : vector<8x128xf32>
      %118 = math.exp %117 : vector<8x128xf32>
      %cst_32 = arith.constant 1.000000e+00 : f32
      %119 = vector.broadcast %cst_32 : f32 to vector<8x128xf32>
      %120 = arith.addf %119, %118 : vector<8x128xf32>
      %121 = arith.divf %119, %120 : vector<8x128xf32>
      %122 = math.tanh %116 : vector<8x128xf32>
      %123 = vector.extract_strided_slice %121 {offsets = [0, 0], sizes = [8, 32], strides = [1, 1]} : vector<8x128xf32> to vector<8x32xf32>
      %124 = vector.extract_strided_slice %121 {offsets = [0, 32], sizes = [8, 32], strides = [1, 1]} : vector<8x128xf32> to vector<8x32xf32>
      %125 = vector.extract_strided_slice %122 {offsets = [0, 64], sizes = [8, 32], strides = [1, 1]} : vector<8x128xf32> to vector<8x32xf32>
      %126 = vector.extract_strided_slice %121 {offsets = [0, 96], sizes = [8, 32], strides = [1, 1]} : vector<8x128xf32> to vector<8x32xf32>
      %127 = arith.mulf %124, %91 : vector<8x32xf32>
      %128 = arith.mulf %123, %125 : vector<8x32xf32>
      %129 = arith.addf %127, %128 : vector<8x32xf32>
      %130 = math.tanh %129 : vector<8x32xf32>
      %131 = arith.mulf %126, %130 : vector<8x32xf32>
      %132 = vector.extract_strided_slice %15 {offsets = [24, 0], sizes = [8, 128], strides = [1, 1]} : vector<64x128xf32> to vector<8x128xf32>
      %133 = vector.extract_strided_slice %114 {offsets = [0, 0], sizes = [8, 128], strides = [1, 1]} : vector<8x256xf32> to vector<8x128xf32>
      %134 = arith.addf %132, %133 : vector<8x128xf32>
      %135 = arith.negf %134 : vector<8x128xf32>
      %136 = math.exp %135 : vector<8x128xf32>
      %cst_33 = arith.constant 1.000000e+00 : f32
      %137 = vector.broadcast %cst_33 : f32 to vector<8x128xf32>
      %138 = arith.addf %137, %136 : vector<8x128xf32>
      %139 = arith.divf %137, %138 : vector<8x128xf32>
      %140 = math.tanh %134 : vector<8x128xf32>
      %141 = vector.extract_strided_slice %139 {offsets = [0, 0], sizes = [8, 32], strides = [1, 1]} : vector<8x128xf32> to vector<8x32xf32>
      %142 = vector.extract_strided_slice %139 {offsets = [0, 32], sizes = [8, 32], strides = [1, 1]} : vector<8x128xf32> to vector<8x32xf32>
      %143 = vector.extract_strided_slice %140 {offsets = [0, 64], sizes = [8, 32], strides = [1, 1]} : vector<8x128xf32> to vector<8x32xf32>
      %144 = vector.extract_strided_slice %139 {offsets = [0, 96], sizes = [8, 32], strides = [1, 1]} : vector<8x128xf32> to vector<8x32xf32>
      %145 = arith.mulf %142, %109 : vector<8x32xf32>
      %146 = arith.mulf %141, %143 : vector<8x32xf32>
      %147 = arith.addf %145, %146 : vector<8x32xf32>
      %148 = math.tanh %147 : vector<8x32xf32>
      %149 = arith.mulf %144, %148 : vector<8x32xf32>
      %150 = tpu.concatenate %149, %131 in 1 : vector<8x32xf32>, vector<8x32xf32> -> vector<8x64xf32>
      %c0_34 = arith.constant 0 : index
      %c0_35 = arith.constant 0 : index
      %151 = vector.load %arg4[%c0_34, %c0_35] : memref<64x256xf32, #tpu.memory_space<vmem>>, vector<64x256xf32>
      %cst_36 = arith.constant dense<0.000000e+00> : vector<8x256xf32>
      %152 = tpu.matmul %150, %151, %cst_36 {dimension_numbers = #tpu.dot_dimension_numbers<[1], [0], [0], [1], [0, 0, 1, 1], [], []>} : vector<8x64xf32>, vector<64x256xf32>, vector<8x256xf32> -> vector<8x256xf32>
      %153 = vector.extract_strided_slice %152 {offsets = [0, 128], sizes = [8, 128], strides = [1, 1]} : vector<8x256xf32> to vector<8x128xf32>
      %154 = arith.addf %153, %18 : vector<8x128xf32>
      %155 = arith.negf %154 : vector<8x128xf32>
      %156 = math.exp %155 : vector<8x128xf32>
      %cst_37 = arith.constant 1.000000e+00 : f32
      %157 = vector.broadcast %cst_37 : f32 to vector<8x128xf32>
      %158 = arith.addf %157, %156 : vector<8x128xf32>
      %159 = arith.divf %157, %158 : vector<8x128xf32>
      %160 = math.tanh %154 : vector<8x128xf32>
      %161 = vector.extract_strided_slice %159 {offsets = [0, 0], sizes = [8, 32], strides = [1, 1]} : vector<8x128xf32> to vector<8x32xf32>
      %162 = vector.extract_strided_slice %159 {offsets = [0, 32], sizes = [8, 32], strides = [1, 1]} : vector<8x128xf32> to vector<8x32xf32>
      %163 = vector.extract_strided_slice %160 {offsets = [0, 64], sizes = [8, 32], strides = [1, 1]} : vector<8x128xf32> to vector<8x32xf32>
      %164 = vector.extract_strided_slice %159 {offsets = [0, 96], sizes = [8, 32], strides = [1, 1]} : vector<8x128xf32> to vector<8x32xf32>
      %165 = arith.mulf %162, %129 : vector<8x32xf32>
      %166 = arith.mulf %161, %163 : vector<8x32xf32>
      %167 = arith.addf %165, %166 : vector<8x32xf32>
      %168 = math.tanh %167 : vector<8x32xf32>
      %169 = arith.mulf %164, %168 : vector<8x32xf32>
      %170 = vector.extract_strided_slice %15 {offsets = [32, 0], sizes = [8, 128], strides = [1, 1]} : vector<64x128xf32> to vector<8x128xf32>
      %171 = vector.extract_strided_slice %152 {offsets = [0, 0], sizes = [8, 128], strides = [1, 1]} : vector<8x256xf32> to vector<8x128xf32>
      %172 = arith.addf %170, %171 : vector<8x128xf32>
      %173 = arith.negf %172 : vector<8x128xf32>
      %174 = math.exp %173 : vector<8x128xf32>
      %cst_38 = arith.constant 1.000000e+00 : f32
      %175 = vector.broadcast %cst_38 : f32 to vector<8x128xf32>
      %176 = arith.addf %175, %174 : vector<8x128xf32>
      %177 = arith.divf %175, %176 : vector<8x128xf32>
      %178 = math.tanh %172 : vector<8x128xf32>
      %179 = vector.extract_strided_slice %177 {offsets = [0, 0], sizes = [8, 32], strides = [1, 1]} : vector<8x128xf32> to vector<8x32xf32>
      %180 = vector.extract_strided_slice %177 {offsets = [0, 32], sizes = [8, 32], strides = [1, 1]} : vector<8x128xf32> to vector<8x32xf32>
      %181 = vector.extract_strided_slice %178 {offsets = [0, 64], sizes = [8, 32], strides = [1, 1]} : vector<8x128xf32> to vector<8x32xf32>
      %182 = vector.extract_strided_slice %177 {offsets = [0, 96], sizes = [8, 32], strides = [1, 1]} : vector<8x128xf32> to vector<8x32xf32>
      %183 = arith.mulf %180, %147 : vector<8x32xf32>
      %184 = arith.mulf %179, %181 : vector<8x32xf32>
      %185 = arith.addf %183, %184 : vector<8x32xf32>
      %186 = math.tanh %185 : vector<8x32xf32>
      %187 = arith.mulf %182, %186 : vector<8x32xf32>
      %188 = tpu.concatenate %187, %169 in 1 : vector<8x32xf32>, vector<8x32xf32> -> vector<8x64xf32>
      %c0_39 = arith.constant 0 : index
      %c0_40 = arith.constant 0 : index
      %189 = vector.load %arg4[%c0_39, %c0_40] : memref<64x256xf32, #tpu.memory_space<vmem>>, vector<64x256xf32>
      %cst_41 = arith.constant dense<0.000000e+00> : vector<8x256xf32>
      %190 = tpu.matmul %188, %189, %cst_41 {dimension_numbers = #tpu.dot_dimension_numbers<[1], [0], [0], [1], [0, 0, 1, 1], [], []>} : vector<8x64xf32>, vector<64x256xf32>, vector<8x256xf32> -> vector<8x256xf32>
      %191 = vector.extract_strided_slice %190 {offsets = [0, 128], sizes = [8, 128], strides = [1, 1]} : vector<8x256xf32> to vector<8x128xf32>
      %192 = arith.addf %191, %18 : vector<8x128xf32>
      %193 = arith.negf %192 : vector<8x128xf32>
      %194 = math.exp %193 : vector<8x128xf32>
      %cst_42 = arith.constant 1.000000e+00 : f32
      %195 = vector.broadcast %cst_42 : f32 to vector<8x128xf32>
      %196 = arith.addf %195, %194 : vector<8x128xf32>
      %197 = arith.divf %195, %196 : vector<8x128xf32>
      %198 = math.tanh %192 : vector<8x128xf32>
      %199 = vector.extract_strided_slice %197 {offsets = [0, 0], sizes = [8, 32], strides = [1, 1]} : vector<8x128xf32> to vector<8x32xf32>
      %200 = vector.extract_strided_slice %197 {offsets = [0, 32], sizes = [8, 32], strides = [1, 1]} : vector<8x128xf32> to vector<8x32xf32>
      %201 = vector.extract_strided_slice %198 {offsets = [0, 64], sizes = [8, 32], strides = [1, 1]} : vector<8x128xf32> to vector<8x32xf32>
      %202 = vector.extract_strided_slice %197 {offsets = [0, 96], sizes = [8, 32], strides = [1, 1]} : vector<8x128xf32> to vector<8x32xf32>
      %203 = arith.mulf %200, %167 : vector<8x32xf32>
      %204 = arith.mulf %199, %201 : vector<8x32xf32>
      %205 = arith.addf %203, %204 : vector<8x32xf32>
      %206 = math.tanh %205 : vector<8x32xf32>
      %207 = arith.mulf %202, %206 : vector<8x32xf32>
      %208 = vector.extract_strided_slice %15 {offsets = [40, 0], sizes = [8, 128], strides = [1, 1]} : vector<64x128xf32> to vector<8x128xf32>
      %209 = vector.extract_strided_slice %190 {offsets = [0, 0], sizes = [8, 128], strides = [1, 1]} : vector<8x256xf32> to vector<8x128xf32>
      %210 = arith.addf %208, %209 : vector<8x128xf32>
      %211 = arith.negf %210 : vector<8x128xf32>
      %212 = math.exp %211 : vector<8x128xf32>
      %cst_43 = arith.constant 1.000000e+00 : f32
      %213 = vector.broadcast %cst_43 : f32 to vector<8x128xf32>
      %214 = arith.addf %213, %212 : vector<8x128xf32>
      %215 = arith.divf %213, %214 : vector<8x128xf32>
      %216 = math.tanh %210 : vector<8x128xf32>
      %217 = vector.extract_strided_slice %215 {offsets = [0, 0], sizes = [8, 32], strides = [1, 1]} : vector<8x128xf32> to vector<8x32xf32>
      %218 = vector.extract_strided_slice %215 {offsets = [0, 32], sizes = [8, 32], strides = [1, 1]} : vector<8x128xf32> to vector<8x32xf32>
      %219 = vector.extract_strided_slice %216 {offsets = [0, 64], sizes = [8, 32], strides = [1, 1]} : vector<8x128xf32> to vector<8x32xf32>
      %220 = vector.extract_strided_slice %215 {offsets = [0, 96], sizes = [8, 32], strides = [1, 1]} : vector<8x128xf32> to vector<8x32xf32>
      %221 = arith.mulf %218, %185 : vector<8x32xf32>
      %222 = arith.mulf %217, %219 : vector<8x32xf32>
      %223 = arith.addf %221, %222 : vector<8x32xf32>
      %224 = math.tanh %223 : vector<8x32xf32>
      %225 = arith.mulf %220, %224 : vector<8x32xf32>
      %226 = tpu.concatenate %225, %207 in 1 : vector<8x32xf32>, vector<8x32xf32> -> vector<8x64xf32>
      %c0_44 = arith.constant 0 : index
      %c0_45 = arith.constant 0 : index
      %227 = vector.load %arg4[%c0_44, %c0_45] : memref<64x256xf32, #tpu.memory_space<vmem>>, vector<64x256xf32>
      %cst_46 = arith.constant dense<0.000000e+00> : vector<8x256xf32>
      %228 = tpu.matmul %226, %227, %cst_46 {dimension_numbers = #tpu.dot_dimension_numbers<[1], [0], [0], [1], [0, 0, 1, 1], [], []>} : vector<8x64xf32>, vector<64x256xf32>, vector<8x256xf32> -> vector<8x256xf32>
      %229 = vector.extract_strided_slice %228 {offsets = [0, 128], sizes = [8, 128], strides = [1, 1]} : vector<8x256xf32> to vector<8x128xf32>
      %230 = arith.addf %229, %18 : vector<8x128xf32>
      %231 = arith.negf %230 : vector<8x128xf32>
      %232 = math.exp %231 : vector<8x128xf32>
      %cst_47 = arith.constant 1.000000e+00 : f32
      %233 = vector.broadcast %cst_47 : f32 to vector<8x128xf32>
      %234 = arith.addf %233, %232 : vector<8x128xf32>
      %235 = arith.divf %233, %234 : vector<8x128xf32>
      %236 = math.tanh %230 : vector<8x128xf32>
      %237 = vector.extract_strided_slice %235 {offsets = [0, 0], sizes = [8, 32], strides = [1, 1]} : vector<8x128xf32> to vector<8x32xf32>
      %238 = vector.extract_strided_slice %235 {offsets = [0, 32], sizes = [8, 32], strides = [1, 1]} : vector<8x128xf32> to vector<8x32xf32>
      %239 = vector.extract_strided_slice %236 {offsets = [0, 64], sizes = [8, 32], strides = [1, 1]} : vector<8x128xf32> to vector<8x32xf32>
      %240 = vector.extract_strided_slice %235 {offsets = [0, 96], sizes = [8, 32], strides = [1, 1]} : vector<8x128xf32> to vector<8x32xf32>
      %241 = arith.mulf %238, %205 : vector<8x32xf32>
      %242 = arith.mulf %237, %239 : vector<8x32xf32>
      %243 = arith.addf %241, %242 : vector<8x32xf32>
      %244 = math.tanh %243 : vector<8x32xf32>
      %245 = arith.mulf %240, %244 : vector<8x32xf32>
      %246 = vector.extract_strided_slice %15 {offsets = [48, 0], sizes = [8, 128], strides = [1, 1]} : vector<64x128xf32> to vector<8x128xf32>
      %247 = vector.extract_strided_slice %228 {offsets = [0, 0], sizes = [8, 128], strides = [1, 1]} : vector<8x256xf32> to vector<8x128xf32>
      %248 = arith.addf %246, %247 : vector<8x128xf32>
      %249 = arith.negf %248 : vector<8x128xf32>
      %250 = math.exp %249 : vector<8x128xf32>
      %cst_48 = arith.constant 1.000000e+00 : f32
      %251 = vector.broadcast %cst_48 : f32 to vector<8x128xf32>
      %252 = arith.addf %251, %250 : vector<8x128xf32>
      %253 = arith.divf %251, %252 : vector<8x128xf32>
      %254 = math.tanh %248 : vector<8x128xf32>
      %255 = vector.extract_strided_slice %253 {offsets = [0, 0], sizes = [8, 32], strides = [1, 1]} : vector<8x128xf32> to vector<8x32xf32>
      %256 = vector.extract_strided_slice %253 {offsets = [0, 32], sizes = [8, 32], strides = [1, 1]} : vector<8x128xf32> to vector<8x32xf32>
      %257 = vector.extract_strided_slice %254 {offsets = [0, 64], sizes = [8, 32], strides = [1, 1]} : vector<8x128xf32> to vector<8x32xf32>
      %258 = vector.extract_strided_slice %253 {offsets = [0, 96], sizes = [8, 32], strides = [1, 1]} : vector<8x128xf32> to vector<8x32xf32>
      %259 = arith.mulf %256, %223 : vector<8x32xf32>
      %260 = arith.mulf %255, %257 : vector<8x32xf32>
      %261 = arith.addf %259, %260 : vector<8x32xf32>
      %262 = math.tanh %261 : vector<8x32xf32>
      %263 = arith.mulf %258, %262 : vector<8x32xf32>
      %264 = tpu.concatenate %263, %245 in 1 : vector<8x32xf32>, vector<8x32xf32> -> vector<8x64xf32>
      %c0_49 = arith.constant 0 : index
      %c0_50 = arith.constant 0 : index
      %265 = vector.load %arg4[%c0_49, %c0_50] : memref<64x256xf32, #tpu.memory_space<vmem>>, vector<64x256xf32>
      %cst_51 = arith.constant dense<0.000000e+00> : vector<8x256xf32>
      %266 = tpu.matmul %264, %265, %cst_51 {dimension_numbers = #tpu.dot_dimension_numbers<[1], [0], [0], [1], [0, 0, 1, 1], [], []>} : vector<8x64xf32>, vector<64x256xf32>, vector<8x256xf32> -> vector<8x256xf32>
      %267 = vector.extract_strided_slice %266 {offsets = [0, 128], sizes = [8, 128], strides = [1, 1]} : vector<8x256xf32> to vector<8x128xf32>
      %268 = arith.addf %267, %18 : vector<8x128xf32>
      %269 = arith.negf %268 : vector<8x128xf32>
      %270 = math.exp %269 : vector<8x128xf32>
      %cst_52 = arith.constant 1.000000e+00 : f32
      %271 = vector.broadcast %cst_52 : f32 to vector<8x128xf32>
      %272 = arith.addf %271, %270 : vector<8x128xf32>
      %273 = arith.divf %271, %272 : vector<8x128xf32>
      %274 = math.tanh %268 : vector<8x128xf32>
      %275 = vector.extract_strided_slice %273 {offsets = [0, 0], sizes = [8, 32], strides = [1, 1]} : vector<8x128xf32> to vector<8x32xf32>
      %276 = vector.extract_strided_slice %273 {offsets = [0, 32], sizes = [8, 32], strides = [1, 1]} : vector<8x128xf32> to vector<8x32xf32>
      %277 = vector.extract_strided_slice %274 {offsets = [0, 64], sizes = [8, 32], strides = [1, 1]} : vector<8x128xf32> to vector<8x32xf32>
      %278 = vector.extract_strided_slice %273 {offsets = [0, 96], sizes = [8, 32], strides = [1, 1]} : vector<8x128xf32> to vector<8x32xf32>
      %279 = arith.mulf %276, %243 : vector<8x32xf32>
      %280 = arith.mulf %275, %277 : vector<8x32xf32>
      %281 = arith.addf %279, %280 : vector<8x32xf32>
      %282 = math.tanh %281 : vector<8x32xf32>
      %283 = arith.mulf %278, %282 : vector<8x32xf32>
      %284 = vector.extract_strided_slice %15 {offsets = [56, 0], sizes = [8, 128], strides = [1, 1]} : vector<64x128xf32> to vector<8x128xf32>
      %285 = vector.extract_strided_slice %266 {offsets = [0, 0], sizes = [8, 128], strides = [1, 1]} : vector<8x256xf32> to vector<8x128xf32>
      %286 = arith.addf %284, %285 : vector<8x128xf32>
      %287 = arith.negf %286 : vector<8x128xf32>
      %288 = math.exp %287 : vector<8x128xf32>
      %cst_53 = arith.constant 1.000000e+00 : f32
      %289 = vector.broadcast %cst_53 : f32 to vector<8x128xf32>
      %290 = arith.addf %289, %288 : vector<8x128xf32>
      %291 = arith.divf %289, %290 : vector<8x128xf32>
      %292 = math.tanh %286 : vector<8x128xf32>
      %293 = vector.extract_strided_slice %291 {offsets = [0, 0], sizes = [8, 32], strides = [1, 1]} : vector<8x128xf32> to vector<8x32xf32>
      %294 = vector.extract_strided_slice %291 {offsets = [0, 32], sizes = [8, 32], strides = [1, 1]} : vector<8x128xf32> to vector<8x32xf32>
      %295 = vector.extract_strided_slice %292 {offsets = [0, 64], sizes = [8, 32], strides = [1, 1]} : vector<8x128xf32> to vector<8x32xf32>
      %296 = vector.extract_strided_slice %291 {offsets = [0, 96], sizes = [8, 32], strides = [1, 1]} : vector<8x128xf32> to vector<8x32xf32>
      %297 = arith.mulf %294, %261 : vector<8x32xf32>
      %298 = arith.mulf %293, %295 : vector<8x32xf32>
      %299 = arith.addf %297, %298 : vector<8x32xf32>
      %300 = math.tanh %299 : vector<8x32xf32>
      %301 = arith.mulf %296, %300 : vector<8x32xf32>
      %302 = tpu.concatenate %301, %283 in 1 : vector<8x32xf32>, vector<8x32xf32> -> vector<8x64xf32>
      %c0_54 = arith.constant 0 : index
      %c0_55 = arith.constant 0 : index
      %303 = vector.load %arg4[%c0_54, %c0_55] : memref<64x256xf32, #tpu.memory_space<vmem>>, vector<64x256xf32>
      %cst_56 = arith.constant dense<0.000000e+00> : vector<8x256xf32>
      %304 = tpu.matmul %302, %303, %cst_56 {dimension_numbers = #tpu.dot_dimension_numbers<[1], [0], [0], [1], [0, 0, 1, 1], [], []>} : vector<8x64xf32>, vector<64x256xf32>, vector<8x256xf32> -> vector<8x256xf32>
      %305 = vector.extract_strided_slice %304 {offsets = [0, 128], sizes = [8, 128], strides = [1, 1]} : vector<8x256xf32> to vector<8x128xf32>
      %306 = arith.addf %305, %18 : vector<8x128xf32>
      %307 = arith.negf %306 : vector<8x128xf32>
      %308 = math.exp %307 : vector<8x128xf32>
      %cst_57 = arith.constant 1.000000e+00 : f32
      %309 = vector.broadcast %cst_57 : f32 to vector<8x128xf32>
      %310 = arith.addf %309, %308 : vector<8x128xf32>
      %311 = arith.divf %309, %310 : vector<8x128xf32>
      %312 = math.tanh %306 : vector<8x128xf32>
      %313 = vector.extract_strided_slice %311 {offsets = [0, 0], sizes = [8, 32], strides = [1, 1]} : vector<8x128xf32> to vector<8x32xf32>
      %314 = vector.extract_strided_slice %311 {offsets = [0, 32], sizes = [8, 32], strides = [1, 1]} : vector<8x128xf32> to vector<8x32xf32>
      %315 = vector.extract_strided_slice %312 {offsets = [0, 64], sizes = [8, 32], strides = [1, 1]} : vector<8x128xf32> to vector<8x32xf32>
      %316 = vector.extract_strided_slice %311 {offsets = [0, 96], sizes = [8, 32], strides = [1, 1]} : vector<8x128xf32> to vector<8x32xf32>
      %317 = arith.mulf %314, %281 : vector<8x32xf32>
      %318 = arith.mulf %313, %315 : vector<8x32xf32>
      %319 = arith.addf %317, %318 : vector<8x32xf32>
      %320 = math.tanh %319 : vector<8x32xf32>
      %321 = arith.mulf %316, %320 : vector<8x32xf32>
      %c0_58 = arith.constant 0 : index
      %c0_59 = arith.constant 0 : index
      %322 = vector.load %arg6[%c0_58, %c0_59] : memref<32x64xf32, #tpu.memory_space<vmem>>, vector<32x64xf32>
      %cst_60 = arith.constant dense<0.000000e+00> : vector<8x64xf32>
      %323 = tpu.matmul %321, %322, %cst_60 {dimension_numbers = #tpu.dot_dimension_numbers<[1], [0], [0], [1], [0, 0, 1, 1], [], []>} : vector<8x32xf32>, vector<32x64xf32>, vector<8x64xf32> -> vector<8x64xf32>
      %c0_61 = arith.constant 0 : index
      %c0_62 = arith.constant 0 : index
      %324 = vector.load %arg7[%c0_61, %c0_62] : memref<1x64xf32, #tpu.memory_space<vmem>>, vector<1x64xf32>
      %325 = vector.broadcast %324 : vector<1x64xf32> to vector<8x64xf32>
      %326 = arith.addf %323, %325 : vector<8x64xf32>
      %cst_63 = arith.constant 0.000000e+00 : f32
      %327 = vector.broadcast %cst_63 : f32 to vector<8x64xf32>
      %328 = arith.maximumf %326, %327 : vector<8x64xf32>
      %c0_64 = arith.constant 0 : index
      %c0_65 = arith.constant 0 : index
      %329 = vector.load %arg8[%c0_64, %c0_65] : memref<64x64xf32, #tpu.memory_space<vmem>>, vector<64x64xf32>
      %cst_66 = arith.constant dense<0.000000e+00> : vector<8x64xf32>
      %330 = tpu.matmul %328, %329, %cst_66 {dimension_numbers = #tpu.dot_dimension_numbers<[1], [0], [0], [1], [0, 0, 1, 1], [], []>} : vector<8x64xf32>, vector<64x64xf32>, vector<8x64xf32> -> vector<8x64xf32>
      %c0_67 = arith.constant 0 : index
      %c0_68 = arith.constant 0 : index
      %331 = vector.load %arg9[%c0_67, %c0_68] : memref<1x64xf32, #tpu.memory_space<vmem>>, vector<1x64xf32>
      %332 = vector.broadcast %331 : vector<1x64xf32> to vector<8x64xf32>
      %333 = arith.addf %330, %332 : vector<8x64xf32>
      %cst_69 = arith.constant 0.000000e+00 : f32
      %334 = vector.broadcast %cst_69 : f32 to vector<8x64xf32>
      %335 = arith.maximumf %333, %334 : vector<8x64xf32>
      %c0_70 = arith.constant 0 : index
      %c0_71 = arith.constant 0 : index
      %336 = vector.load %arg13[%c0_70, %c0_71] : memref<8x64xf32, #tpu.memory_space<vmem>>, vector<8x64xf32>
      tpu.vector_store %arg13[%c0_70, %c0_71], %335 {strides = array<i32>} : memref<8x64xf32, #tpu.memory_space<vmem>>, vector<8x64xf32>,
    } else {
    }
    %c0 = arith.constant 0 : index
    %c0_1 = arith.constant 0 : index
    %3 = vector.load %arg13[%c0, %c0_1] : memref<8x64xf32, #tpu.memory_space<vmem>>, vector<8x64xf32>
    %c0_2 = arith.constant 0 : index
    %c0_3 = arith.constant 0 : index
    %4 = vector.load %arg10[%c0_2, %c0_3] : memref<64x128xf32, #tpu.memory_space<vmem>>, vector<64x128xf32>
    %cst = arith.constant dense<0.000000e+00> : vector<8x128xf32>
    %5 = tpu.matmul %3, %4, %cst {dimension_numbers = #tpu.dot_dimension_numbers<[1], [0], [0], [1], [0, 0, 1, 1], [], []>} : vector<8x64xf32>, vector<64x128xf32>, vector<8x128xf32> -> vector<8x128xf32>
    %c0_4 = arith.constant 0 : index
    %c0_5 = arith.constant 0 : index
    %6 = vector.load %arg11[%c0_4, %c0_5] : memref<1x128xf32, #tpu.memory_space<vmem>>, vector<1x128xf32>
    %7 = vector.broadcast %6 : vector<1x128xf32> to vector<8x128xf32>
    %8 = arith.addf %5, %7 : vector<8x128xf32>
    %c0_6 = arith.constant 0 : index
    %c0_7 = arith.constant 0 : index
    %9 = vector.load %arg12[%c0_6, %c0_7] : memref<8x128xf32, #tpu.memory_space<vmem>>, vector<8x128xf32>
    tpu.vector_store %arg12[%c0_6, %c0_7], %8 {strides = array<i32>} : memref<8x128xf32, #tpu.memory_space<vmem>>, vector<8x128xf32>,
    return
  }
  func.func @transform_0(%arg0: i32) -> (i32, i32) {
    %c0_i32 = arith.constant 0 : i32
    %c0_i32_0 = arith.constant 0 : i32
    %c0_i32_1 = arith.constant 0 : i32
    return %c0_i32, %c0_i32_0 : i32, i32
  }
  func.func @transform_1(%arg0: i32) -> (i32, i32) {
    %c0_i32 = arith.constant 0 : i32
    %c0_i32_0 = arith.constant 0 : i32
    %c0_i32_1 = arith.constant 0 : i32
    return %c0_i32, %c0_i32_0 : i32, i32
  }
  func.func @transform_2(%arg0: i32) -> (i32, i32) {
    %c0_i32 = arith.constant 0 : i32
    %c0_i32_0 = arith.constant 0 : i32
    %c0_i32_1 = arith.constant 0 : i32
    return %c0_i32, %c0_i32_0 : i32, i32
  }
  func.func @transform_3(%arg0: i32) -> (i32, i32) {
    %c0_i32 = arith.constant 0 : i32
    %c0_i32_0 = arith.constant 0 : i32
    %c0_i32_1 = arith.constant 0 : i32
    return %c0_i32, %c0_i32_0 : i32, i32
  }
  func.func @transform_4(%arg0: i32) -> (i32, i32) {
    %c0_i32 = arith.constant 0 : i32
    %c0_i32_0 = arith.constant 0 : i32
    %c0_i32_1 = arith.constant 0 : i32
    return %c0_i32, %c0_i32_0 : i32, i32
  }
  func.func @transform_5(%arg0: i32) -> (i32, i32) {
    %c0_i32 = arith.constant 0 : i32
    %c0_i32_0 = arith.constant 0 : i32
    %c0_i32_1 = arith.constant 0 : i32
    return %c0_i32, %c0_i32_0 : i32, i32
  }
  func.func @transform_6(%arg0: i32) -> (i32, i32) {
    %c0_i32 = arith.constant 0 : i32
    %c0_i32_0 = arith.constant 0 : i32
    %c0_i32_1 = arith.constant 0 : i32
    return %c0_i32, %c0_i32_0 : i32, i32
  }
  func.func @transform_7(%arg0: i32) -> (i32, i32) {
    %c0_i32 = arith.constant 0 : i32
    %c0_i32_0 = arith.constant 0 : i32
    %c0_i32_1 = arith.constant 0 : i32
    return %c0_i32, %c0_i32_0 : i32, i32
  }
  func.func @transform_8(%arg0: i32) -> (i32, i32) {
    %c0_i32 = arith.constant 0 : i32
    %c0_i32_0 = arith.constant 0 : i32
    %c0_i32_1 = arith.constant 0 : i32
    return %c0_i32, %c0_i32_0 : i32, i32
  }
  func.func @transform_9(%arg0: i32) -> (i32, i32) {
    %c0_i32 = arith.constant 0 : i32
    %c0_i32_0 = arith.constant 0 : i32
    return %c0_i32, %arg0 : i32, i32
  }
  func.func @transform_10(%arg0: i32) -> (i32, i32) {
    %c0_i32 = arith.constant 0 : i32
    %c0_i32_0 = arith.constant 0 : i32
    return %c0_i32, %arg0 : i32, i32
  }
  func.func @transform_11(%arg0: i32) -> (i32, i32) {
    %c0_i32 = arith.constant 0 : i32
    %c0_i32_0 = arith.constant 0 : i32
    return %c0_i32, %arg0 : i32, i32
  }
}

</mosaic_0001>

<bundles_post_ra>
// kernel: shred_forward.1
= control target key start
LH: loop header
LB: loop body
LE: loop exit
PB: predicated region body
PF: predicated region fallthrough
CT: control target
= control target key end

     0   :  { %vm80_vm0 = vcmask 1043456   ;;  %vm55_vm1 = vcmask 31744   ;;  %s1439_s23 = smov 64   ;;  %vm170_vm6 = vcmask 261120   ;;  %vm188_vm7 = vcmask 523264   ;;  %s1987_s1 = inlined_call_operand.vmem [shape: f32[4,128], index: 1, kind: input, shape index: {}]   ;;  %s1988_s0 = inlined_call_operand.vmem [shape: f32[64,4], index: 0, kind: input, shape index: {}]   ;;  %s1989_s2 = inlined_call_operand.vmem [shape: f32[1,128], index: 2, kind: input, shape index: {}]   ;;  %s1990_s3 = inlined_call_operand.vmem [shape: f32[64,256], index: 3, kind: input, shape index: {}]   ;;  %s1991_s4 = inlined_call_operand.vmem [shape: f32[1,128], index: 4, kind: input, shape index: {}]   ;;  %s1992_s5 = inlined_call_operand.vmem [shape: f32[32,64], index: 5, kind: input, shape index: {}]   ;;  %s1993_s6 = inlined_call_operand.vmem [shape: f32[1,64], index: 6, kind: input, shape index: {}]   ;;  %s1994_s7 = inlined_call_operand.vmem [shape: f32[64,64], index: 7, kind: input, shape index: {}]   ;;  %s1995_s8 = inlined_call_operand.vmem [shape: f32[1,64], index: 8, kind: input, shape index: {}]   ;;  %s1996_s9 = inlined_call_operand.vmem [shape: f32[64,128], index: 9, kind: input, shape index: {}]   ;;  %s1997_s10 = inlined_call_operand.vmem [shape: f32[1,128], index: 10, kind: input, shape index: {}]   ;;  %s1998_s11 = inlined_call_operand.vmem [shape: f32[8,128], index: 11, kind: output, shape index: {}]  }
   0x1   :  { %v50_v0 = vld [vmem:[%s1987_s1] sm:$0xf]  ;;  %s1440_s1 = smov 32   ;;  %v1523_v25 = vld [vmem:[%s1990_s3 + $0x70] sm:$0xff]  ;;  %v1528_v26 = vld [vmem:[%s1990_s3 + $0x78] sm:$0xff] }
   0x2   :  { %v42_v1 = vld [vmem:[%s1988_s0] sm:$0xff]  ;;  %1259 = vmatpush.msk.msra.mxu0 %vm80_vm0, %v50_v0  ;;  %200 = vmatpush.msra.mxu1 %v1523_v25  ;;  %v1540_v28 = vld [vmem:[%s1990_s3 + $0x68] sm:$0xff]  ;;  %v1545_v29 = vld [vmem:[%s1990_s3 + $0x50] sm:$0xff] }
   0x3   :  { %1260 = vmatmul.msk.f32.vlgmr.msra.gmra.mxu0 %vm55_vm1, %v42_v1  ;;  %v1511_v2 = vld [vmem:[%s1989_s2] ss:$0 sm:$0xff]  ;;  %220 = vmatpush.msra.mxu2 %v1528_v26  ;;  %v1550_v30 = vld [vmem:[%s1990_s3 + $0x58] sm:$0xff]  ;;  %v1564_v32 = vld [vmem:[%s1990_s3 + $0x48] sm:$0xff] }
   0x4   :  { %v1533_v27 = vld [vmem:[%s1990_s3 + $0x60] sm:$0xff]  ;;  %328 = vmatpush.msra.mxu3 %v1523_v25  ;;  %968 = vmatpush.msrb.mxu0 %v1523_v25  ;;  %v43_v33 = vld [vmem:[%s1988_s0 + $0x8] sm:$0xff]  ;;  %v1576_v34 = vld [vmem:[%s1990_s3 + $0x30] sm:$0xff] }
   0x5   :  { %201 = vmatpush.msra.mxu1 %v1533_v27  ;;  %221 = vmatpush.msra.mxu2 %v1540_v28  ;;  %v1559_v31 = vld [vmem:[%s1990_s3 + $0x40] sm:$0xff]  ;;  %v1581_v35 = vld [vmem:[%s1990_s3 + $0x38] sm:$0xff]  ;;  %v1595_v37 = vld [vmem:[%s1990_s3 + $0x28] sm:$0xff] }
   0x6   :  { %329 = vmatpush.msra.mxu3 %v1533_v27  ;;  %969 = vmatpush.msrb.mxu0 %v1533_v27  ;;  %v1590_v36 = vld [vmem:[%s1990_s3 + $0x20] sm:$0xff]  ;;  %v1604_v38 = vld [vmem:[%s1990_s3 + $0x10] sm:$0xff]  ;;  %v1609_v39 = vld [vmem:[%s1990_s3 + $0x18] sm:$0xff] }
   0x7   :  { %202 = vmatpush.msra.mxu1 %v1545_v29  ;;  %222 = vmatpush.msra.mxu2 %v1550_v30  ;;  %v1626_v42 = vld [vmem:[%s1990_s3] sm:$0xff]  ;;  %v1631_v43 = vld [vmem:[%s1990_s3 + $0x8] sm:$0xff] }
   0x8   :  { %330 = vmatpush.msra.mxu3 %v1545_v29  ;;  %970 = vmatpush.msrb.mxu0 %v1545_v29  ;;  %v1683_v46 = vld [vmem:[%s1991_s4] ss:$0 sm:$0xff] }
   0x9   :  { %203 = vmatpush.msra.mxu1 %v1559_v31  ;;  %223 = vmatpush.msra.mxu2 %v1564_v32 }
   0xa   :  { %331 = vmatpush.msra.mxu3 %v1559_v31  ;;  %971 = vmatpush.msrb.mxu0 %v1559_v31 }
   0xb   :  { %1261 = vmatmul.msk.f32.gmra.mxu0 %vm55_vm1, %v43_v33  ;;  %204 = vmatpush.msra.mxu1 %v1576_v34 }
   0xc   :  { %224 = vmatpush.msra.mxu2 %v1581_v35  ;;  %332 = vmatpush.msra.mxu3 %v1576_v34 }
   0xd   :  { %205 = vmatpush.msra.mxu1 %v1590_v36  ;;  %972 = vmatpush.msrb.mxu0 %v1576_v34 }
   0xe   :  { %225 = vmatpush.msra.mxu2 %v1595_v37  ;;  %333 = vmatpush.msra.mxu3 %v1590_v36 }
   0xf   :  { %206 = vmatpush.msra.mxu1 %v1604_v38  ;;  %973 = vmatpush.msrb.mxu0 %v1590_v36 }
  0x10   :  { %226 = vmatpush.msra.mxu2 %v1609_v39  ;;  %334 = vmatpush.msra.mxu3 %v1604_v38 }
  0x11   :  { %974 = vmatpush.msrb.mxu0 %v1604_v38  ;;  %207 = vmatpush.msra.mxu1 %v1626_v42 }
  0x12   :  { %227 = vmatpush.msra.mxu2 %v1631_v43  ;;  %335 = vmatpush.msra.mxu3 %v1626_v42 }
  0x13   :  { %348 = vmatpush.msrb.mxu1 %v1528_v26  ;;  %975 = vmatpush.msrb.mxu0 %v1626_v42 }
  0x14   :  { %456 = vmatpush.msrb.mxu2 %v1523_v25  ;;  %476 = vmatpush.msrb.mxu3 %v1528_v26 }
  0x15   :  { %349 = vmatpush.msrb.mxu1 %v1540_v28 }
  0x16   :  { %457 = vmatpush.msrb.mxu2 %v1533_v27  ;;  %477 = vmatpush.msrb.mxu3 %v1540_v28 }
  0x17   :  { %350 = vmatpush.msrb.mxu1 %v1550_v30 }
  0x18   :  { %458 = vmatpush.msrb.mxu2 %v1545_v29  ;;  %478 = vmatpush.msrb.mxu3 %v1550_v30 }
  0x19   :  { %351 = vmatpush.msrb.mxu1 %v1564_v32 }
  0x1a   :  { %459 = vmatpush.msrb.mxu2 %v1559_v31  ;;  %479 = vmatpush.msrb.mxu3 %v1564_v32 }
  0x1b   :  { %352 = vmatpush.msrb.mxu1 %v1581_v35 }
  0x1c   :  { %460 = vmatpush.msrb.mxu2 %v1576_v34  ;;  %480 = vmatpush.msrb.mxu3 %v1581_v35 }
  0x1d   :  { %353 = vmatpush.msrb.mxu1 %v1595_v37 }
  0x1e   :  { %461 = vmatpush.msrb.mxu2 %v1590_v36  ;;  %481 = vmatpush.msrb.mxu3 %v1595_v37 }
  0x1f   :  { %354 = vmatpush.msrb.mxu1 %v1609_v39 }
  0x20   :  { %462 = vmatpush.msrb.mxu2 %v1604_v38  ;;  %482 = vmatpush.msrb.mxu3 %v1609_v39 }
  0x21   :  { %355 = vmatpush.msrb.mxu1 %v1631_v43 }
  0x22   :  { %463 = vmatpush.msrb.mxu2 %v1626_v42  ;;  %483 = vmatpush.msrb.mxu3 %v1631_v43 }
  0x80   :  { %v101_v3 = vpop.f32.mrf.mxu0 }
  0x81   :  { %v102_v4 = vadd.f32 %v1511_v2, %v101_v3 }
  0x83   :  { %1309 = vtanh.f32 %v102_v4  ;;  %v1268_v6 = vmul.f32 -1.442695, %v102_v4 }
  0x85   :  { %1311 = vpow2.f32 %v1268_v6 }
  0x88   :  { %v104_v47 = vpop.f32.mrf.mxu0 }
  0x89   :  { %v1310_v5 = vpop.eup %1309  ;;  %v105_v50 = vadd.f32 %v1511_v2, %v104_v47 }
  0x8a   :  { %151 = vrot.lane.b32.xlu0 %v1310_v5, %s1439_s23 }
  0x8b   :  { %v1312_v7 = vpop.eup %1311 }
  0x8c   :  { %v132_v8 = vadd.f32 1.0, %v1312_v7 }
  0x8e   :  { %1313 = vrcp.f32 %v132_v8  ;;  %v144_v14 = vand.u32 2147483648, %v132_v8  ;;  %vm138_vm3 = vweird.f32 %v132_v8  ;;  %v142_v15 = vand.u32 2147483647, %v132_v8 }
  0x90   :  { %v145_v17 = vor.u32 1.1754944e-38, %v144_v14  ;;  %vm143_vm5 = vcmp.eq.f32.partialorder %v142_v15, 8.507059e+37 }
  0x94   :  { %v1314_v9 = vpop.eup %1313 }
  0x95   :  { %v134_v10 = vmul.f32 %v1314_v9, %v132_v8  ;;  %vm139_vm2 = vweird.f32 %v1314_v9 }
  0x96   :  { %vm140_vm4 = vmor %vm138_vm3, %vm139_vm2 }
  0x97   :  { %v135_v11 = vsub.f32 1.0, %v134_v10 }
  0x99   :  { %v136_v12 = vmul.f32 %v1314_v9, %v135_v11 }
  0x9b   :  { %v137_v13 = vadd.f32 %v1314_v9, %v136_v12 }
  0x9d   :  { %v141_v16 = vsel %vm140_vm4, %v1314_v9, %v137_v13 }
  0x9e   :  { %v146_v19 = vsel %vm143_vm5, %v145_v17, %v141_v16 }
  0x9f   :  { %v149_v21 = vmul.f32 0.0, %v146_v19 }
  0xfc   :  { %v152_v18 = vpop.permute.xlu0 %151 }
  0xfd   :  { %v154_v20 = vmul.f32 %v152_v18, %v146_v19 }
  0xff   :  { %156 = vrot.lane.b32.xlu0 %v154_v20, %s1440_s1 }
 0x171   :  { %v157_v22 = vpop.permute.xlu0 %156 }
 0x172   :  { %v1516_v23 = vadd.f32 %v157_v22, %v149_v21 }
 0x174   :  { %1315 = vtanh.f32 %v1516_v23 }
 0x17a   :  { %v1316_v24 = vpop.eup %1315 }
 0x17b   :  { %162 = vrot.lane.b32.xlu1 %v1316_v24, %s1439_s23 }
 0x1ed   :  { %v163_v40 = vpop.permute.xlu1 %162 }
 0x1ee   :  { %v165_v41 = vmul.f32 %v163_v40, %v146_v19 }
 0x1f0   :  { %167 = vrot.lane.b32.xlu1 %v165_v41, %s1440_s1 }
 0x262   :  { %v168_v44 = vpop.permute.xlu1 %167 }
 0x263   :  { %v171_v45 = vsel %vm170_vm6, %v168_v44, 0.0 }
 0x264   :  { %1269 = vmatmul.msk.f32.vlgmr.msra.gmra.mxu1 %vm188_vm7, %v171_v45  ;;  %1270 = vmatmul.msk.f32.vlgmr.msra.gmra.mxu2 %vm188_vm7, %v171_v45 }
 0x265   :  { %584 = vmatpush.msra.mxu1 %v1523_v25  ;;  %604 = vmatpush.msra.mxu2 %v1528_v26 }
 0x267   :  { %585 = vmatpush.msra.mxu1 %v1533_v27  ;;  %605 = vmatpush.msra.mxu2 %v1540_v28 }
 0x269   :  { %586 = vmatpush.msra.mxu1 %v1545_v29  ;;  %606 = vmatpush.msra.mxu2 %v1550_v30 }
 0x26b   :  { %587 = vmatpush.msra.mxu1 %v1559_v31  ;;  %607 = vmatpush.msra.mxu2 %v1564_v32 }
 0x26d   :  { %588 = vmatpush.msra.mxu1 %v1576_v34  ;;  %608 = vmatpush.msra.mxu2 %v1581_v35 }
 0x26f   :  { %589 = vmatpush.msra.mxu1 %v1590_v36  ;;  %609 = vmatpush.msra.mxu2 %v1595_v37 }
 0x271   :  { %590 = vmatpush.msra.mxu1 %v1604_v38  ;;  %610 = vmatpush.msra.mxu2 %v1609_v39 }
 0x273   :  { %591 = vmatpush.msra.mxu1 %v1626_v42  ;;  %611 = vmatpush.msra.mxu2 %v1631_v43 }
 0x2e1   :  { %v209_v51 = vpop.f32.mrf.mxu1 }
 0x2e2   :  { %v270_v52 = vadd.f32 %v209_v51, %v105_v50 }
 0x2e4   :  { %v1272_v56 = vmul.f32 -1.442695, %v270_v52 }
 0x2e7   :  { %v229_v48 = vpop.f32.mrf.mxu2 }
 0x2e8   :  { %v232_v49 = vadd.f32 %v1683_v46, %v229_v48 }
 0x2ea   :  { %1317 = vtanh.f32 %v232_v49  ;;  %v1271_v55 = vmul.f32 -1.442695, %v232_v49 }
 0x2eb   :  { %1319 = vtanh.f32 %v270_v52 }
 0x2ec   :  { %1321 = vpow2.f32 %v1271_v55 }
 0x2ed   :  { %1323 = vpow2.f32 %v1272_v56 }
 0x2f0   :  { %v1318_v53 = vpop.eup %1317 }
 0x2f1   :  { %255 = vrot.lane.b32.xlu2 %v1318_v53, %s1439_s23  ;;  %v1320_v54 = vpop.eup %1319 }
 0x2f2   :  { %v1322_v57 = vpop.eup %1321 }
 0x2f3   :  { %v236_v58 = vadd.f32 1.0, %v1322_v57  ;;  %v1324_v59 = vpop.eup %1323 }
 0x2f4   :  { %v274_v60 = vadd.f32 1.0, %v1324_v59 }
 0x2f5   :  { %1325 = vrcp.f32 %v236_v58  ;;  %v248_v6 = vand.u32 2147483648, %v236_v58  ;;  %vm242_vm9 = vweird.f32 %v236_v58  ;;  %v246_v7 = vand.u32 2147483647, %v236_v58 }
 0x2f6   :  { %1327 = vrcp.f32 %v274_v60  ;;  %v286_v15 = vand.u32 2147483648, %v274_v60  ;;  %vm280_vm13 = vweird.f32 %v274_v60  ;;  %v284_v16 = vand.u32 2147483647, %v274_v60 }
 0x2f7   :  { %v249_v10 = vor.u32 1.1754944e-38, %v248_v6  ;;  %vm247_vm11 = vcmp.eq.f32.partialorder %v246_v7, 8.507059e+37 }
 0x2f8   :  { %v287_v18 = vor.u32 1.1754944e-38, %v286_v15  ;;  %vm285_vm15 = vcmp.eq.f32.partialorder %v284_v16, 8.507059e+37 }
 0x2f9   :  { %293 = vrot.lane.b32.xlu2 %v1320_v54, %s1439_s23 }
 0x2fb   :  { %v1326_v61 = vpop.eup %1325 }
 0x2fc   :  { %v238_v62 = vmul.f32 %v1326_v61, %v236_v58  ;;  %v1328_v0 = vpop.eup %1327  ;;  %vm243_vm8 = vweird.f32 %v1326_v61 }
 0x2fd   :  { %v276_v3 = vmul.f32 %v1328_v0, %v274_v60  ;;  %vm244_vm10 = vmor %vm242_vm9, %vm243_vm8  ;;  %vm281_vm12 = vweird.f32 %v1328_v0 }
 0x2fe   :  { %v239_v63 = vsub.f32 1.0, %v238_v62  ;;  %vm282_vm14 = vmor %vm280_vm13, %vm281_vm12 }
 0x2ff   :  { %v277_v5 = vsub.f32 1.0, %v276_v3 }
 0x300   :  { %v240_v1 = vmul.f32 %v1326_v61, %v239_v63 }
 0x301   :  { %v278_v9 = vmul.f32 %v1328_v0, %v277_v5 }
 0x302   :  { %v241_v4 = vadd.f32 %v1326_v61, %v240_v1 }
 0x303   :  { %v279_v14 = vadd.f32 %v1328_v0, %v278_v9 }
 0x304   :  { %v245_v8 = vsel %vm244_vm10, %v1326_v61, %v241_v4 }
 0x305   :  { %v250_v12 = vsel %vm247_vm11, %v249_v10, %v245_v8  ;;  %v283_v17 = vsel %vm282_vm14, %v1328_v0, %v279_v14 }
 0x306   :  { %v288_v20 = vsel %vm285_vm15, %v287_v18, %v283_v17  ;;  %v253_v22 = vmul.f32 0.0, %v250_v12 }
 0x307   :  { %v291_v40 = vmul.f32 %v288_v20, %v1516_v23  ;;  %v44_v23 = vld [vmem:[%s1988_s0 + $0x10] sm:$0xff] }
 0x308   :  { %1262 = vmatmul.msk.f32.gmra.mxu0 %vm55_vm1, %v44_v23 }
 0x34b   :  { %v256_v11 = vpop.permute.xlu2 %255 }
 0x34c   :  { %v258_v13 = vmul.f32 %v256_v11, %v250_v12 }
 0x34e   :  { %260 = vrot.lane.b32.xlu0 %v258_v13, %s1440_s1 }
 0x353   :  { %v294_v19 = vpop.permute.xlu2 %293 }
 0x354   :  { %v296_v21 = vmul.f32 %v294_v19, %v288_v20 }
 0x356   :  { %298 = vrot.lane.b32.xlu1 %v296_v21, %s1440_s1 }
 0x385   :  { %v107_v56 = vpop.f32.mrf.mxu0 }
 0x386   :  { %v108_v58 = vadd.f32 %v1511_v2, %v107_v56 }
 0x3c0   :  { %v261_v24 = vpop.permute.xlu0 %260 }
 0x3c1   :  { %v1691_v33 = vadd.f32 %v261_v24, %v253_v22 }
 0x3c3   :  { %1329 = vtanh.f32 %v1691_v33 }
 0x3c8   :  { %v299_v41 = vpop.permute.xlu1 %298 }
 0x3c9   :  { %v1330_v44 = vpop.eup %1329  ;;  %v1695_v45 = vadd.f32 %v299_v41, %v291_v40 }
 0x3ca   :  { %266 = vrot.lane.b32.xlu2 %v1330_v44, %s1439_s23 }
 0x3cb   :  { %1331 = vtanh.f32 %v1695_v45 }
 0x3d1   :  { %v1332_v47 = vpop.eup %1331 }
 0x3d2   :  { %304 = vrot.lane.b32.xlu0 %v1332_v47, %s1439_s23 }
 0x424   :  { %v267_v48 = vpop.permute.xlu2 %266 }
 0x425   :  { %v269_v49 = vmul.f32 %v267_v48, %v250_v12 }
 0x427   :  { %313 = vrot.lane.b32.xlu2 %v269_v49, %s1439_s23 }
 0x444   :  { %v305_v50 = vpop.permute.xlu0 %304 }
 0x445   :  { %v307_v51 = vmul.f32 %v305_v50, %v288_v20 }
 0x447   :  { %309 = vrot.lane.b32.xlu1 %v307_v51, %s1440_s1 }
 0x481   :  { %v314_v52 = vpop.permute.xlu2 %313 }
 0x4b9   :  { %v310_v53 = vpop.permute.xlu1 %309 }
 0x4ba   :  { %v316_v54 = vsel %vm170_vm6, %v310_v53, %v314_v52 }
 0x4bb   :  { %1273 = vmatmul.msk.f32.vlgmr.msra.gmra.mxu3 %vm188_vm7, %v316_v54  ;;  %1274 = vmatmul.msk.f32.vlgmr.msrb.gmra.mxu1 %vm188_vm7, %v316_v54 }
 0x4bc   :  { %712 = vmatpush.msra.mxu3 %v1523_v25  ;;  %732 = vmatpush.msrb.mxu1 %v1528_v26 }
 0x4be   :  { %713 = vmatpush.msra.mxu3 %v1533_v27  ;;  %733 = vmatpush.msrb.mxu1 %v1540_v28 }
 0x4c0   :  { %714 = vmatpush.msra.mxu3 %v1545_v29  ;;  %734 = vmatpush.msrb.mxu1 %v1550_v30 }
 0x4c2   :  { %715 = vmatpush.msra.mxu3 %v1559_v31  ;;  %735 = vmatpush.msrb.mxu1 %v1564_v32 }
 0x4c4   :  { %716 = vmatpush.msra.mxu3 %v1576_v34  ;;  %736 = vmatpush.msrb.mxu1 %v1581_v35 }
 0x4c6   :  { %717 = vmatpush.msra.mxu3 %v1590_v36  ;;  %737 = vmatpush.msrb.mxu1 %v1595_v37 }
 0x4c8   :  { %718 = vmatpush.msra.mxu3 %v1604_v38  ;;  %738 = vmatpush.msrb.mxu1 %v1609_v39 }
 0x4ca   :  { %719 = vmatpush.msra.mxu3 %v1626_v42  ;;  %739 = vmatpush.msrb.mxu1 %v1631_v43 }
 0x538   :  { %v357_v55 = vpop.f32.mrf.mxu1 }
 0x539   :  { %v360_v57 = vadd.f32 %v1683_v46, %v357_v55 }
 0x53b   :  { %1333 = vtanh.f32 %v360_v57  ;;  %v1275_v63 = vmul.f32 -1.442695, %v360_v57 }
 0x53e   :  { %v337_v59 = vpop.f32.mrf.mxu3 }
 0x53f   :  { %v398_v60 = vadd.f32 %v337_v59, %v108_v58 }
 0x541   :  { %v1334_v61 = vpop.eup %1333  ;;  %1335 = vtanh.f32 %v398_v60  ;;  %v1276_v0 = vmul.f32 -1.442695, %v398_v60 }
 0x542   :  { %383 = vrot.lane.b32.xlu0 %v1334_v61, %s1439_s23  ;;  %1337 = vpow2.f32 %v1275_v63 }
 0x543   :  { %1339 = vpow2.f32 %v1276_v0 }
 0x547   :  { %v1336_v62 = vpop.eup %1335 }
 0x548   :  { %421 = vrot.lane.b32.xlu1 %v1336_v62, %s1439_s23  ;;  %v1338_v1 = vpop.eup %1337 }
 0x549   :  { %v364_v3 = vadd.f32 1.0, %v1338_v1  ;;  %v1340_v4 = vpop.eup %1339 }
 0x54a   :  { %v402_v5 = vadd.f32 1.0, %v1340_v4 }
 0x54b   :  { %1341 = vrcp.f32 %v364_v3  ;;  %v376_v14 = vand.u32 2147483648, %v364_v3  ;;  %vm370_vm2 = vweird.f32 %v364_v3  ;;  %v374_v15 = vand.u32 2147483647, %v364_v3 }
 0x54c   :  { %1343 = vrcp.f32 %v402_v5  ;;  %v414_v22 = vand.u32 2147483648, %v402_v5  ;;  %vm408_vm8 = vweird.f32 %v402_v5  ;;  %v412_v40 = vand.u32 2147483647, %v402_v5 }
 0x54d   :  { %v377_v18 = vor.u32 1.1754944e-38, %v376_v14  ;;  %vm375_vm4 = vcmp.eq.f32.partialorder %v374_v15, 8.507059e+37 }
 0x54e   :  { %v415_v44 = vor.u32 1.1754944e-38, %v414_v22  ;;  %vm413_vm10 = vcmp.eq.f32.partialorder %v412_v40, 8.507059e+37 }
 0x551   :  { %v1342_v6 = vpop.eup %1341 }
 0x552   :  { %v366_v7 = vmul.f32 %v1342_v6, %v364_v3  ;;  %v1344_v8 = vpop.eup %1343  ;;  %vm371_vm0 = vweird.f32 %v1342_v6 }
 0x553   :  { %v404_v10 = vmul.f32 %v1344_v8, %v402_v5  ;;  %vm372_vm3 = vmor %vm370_vm2, %vm371_vm0  ;;  %vm409_vm5 = vweird.f32 %v1344_v8 }
 0x554   :  { %v367_v9 = vsub.f32 1.0, %v366_v7  ;;  %vm410_vm9 = vmor %vm408_vm8, %vm409_vm5 }
 0x555   :  { %v405_v12 = vsub.f32 1.0, %v404_v10 }
 0x556   :  { %v368_v11 = vmul.f32 %v1342_v6, %v367_v9 }
 0x557   :  { %v406_v16 = vmul.f32 %v1344_v8, %v405_v12 }
 0x558   :  { %v369_v13 = vadd.f32 %v1342_v6, %v368_v11 }
 0x559   :  { %v407_v19 = vadd.f32 %v1344_v8, %v406_v16 }
 0x55a   :  { %v373_v17 = vsel %vm372_vm3, %v1342_v6, %v369_v13 }
 0x55b   :  { %v378_v21 = vsel %vm375_vm4, %v377_v18, %v373_v17  ;;  %v411_v41 = vsel %vm410_vm9, %v1344_v8, %v407_v19 }
 0x55c   :  { %v416_v48 = vsel %vm413_vm10, %v415_v44, %v411_v41  ;;  %v381_v50 = vmul.f32 %v378_v21, %v1691_v33 }
 0x55d   :  { %v419_v53 = vmul.f32 %v416_v48, %v1695_v45  ;;  %v45_v45 = vld [vmem:[%s1988_s0 + $0x18] sm:$0xff] }
 0x55e   :  { %1263 = vmatmul.msk.f32.gmra.mxu0 %vm55_vm1, %v45_v45  ;;  %v46_v45 = vld [vmem:[%s1988_s0 + $0x20] sm:$0xff] }
 0x566   :  { %1264 = vmatmul.msk.f32.gmra.mxu0 %vm55_vm1, %v46_v45 }
 0x5b4   :  { %v384_v20 = vpop.permute.xlu0 %383 }
 0x5b5   :  { %v386_v24 = vmul.f32 %v384_v20, %v378_v21 }
 0x5b7   :  { %388 = vrot.lane.b32.xlu2 %v386_v24, %s1440_s1 }
 0x5ba   :  { %v422_v47 = vpop.permute.xlu1 %421 }
 0x5bb   :  { %v424_v49 = vmul.f32 %v422_v47, %v416_v48 }
 0x5bd   :  { %426 = vrot.lane.b32.xlu0 %v424_v49, %s1440_s1 }
 0x611   :  { %v389_v51 = vpop.permute.xlu2 %388 }
 0x612   :  { %v1732_v23 = vadd.f32 %v389_v51, %v381_v50 }
 0x614   :  { %1345 = vtanh.f32 %v1732_v23 }
 0x61a   :  { %v1346_v52 = vpop.eup %1345 }
 0x61b   :  { %394 = vrot.lane.b32.xlu1 %v1346_v52, %s1439_s23 }
 0x62f   :  { %v427_v54 = vpop.permute.xlu0 %426 }
 0x630   :  { %v1737_v55 = vadd.f32 %v427_v54, %v419_v53 }
 0x632   :  { %1347 = vtanh.f32 %v1737_v55 }
 0x638   :  { %v1348_v56 = vpop.eup %1347 }
 0x639   :  { %432 = vrot.lane.b32.xlu2 %v1348_v56, %s1439_s23 }
 0x68d   :  { %v395_v57 = vpop.permute.xlu1 %394 }
 0x68e   :  { %v397_v33 = vmul.f32 %v395_v57, %v378_v21 }
 0x690   :  { %441 = vrot.lane.b32.xlu1 %v397_v33, %s1439_s23 }
 0x693   :  { %v433_v58 = vpop.permute.xlu2 %432 }
 0x694   :  { %v435_v59 = vmul.f32 %v433_v58, %v416_v48 }
 0x696   :  { %437 = vrot.lane.b32.xlu0 %v435_v59, %s1440_s1 }
 0x702   :  { %v442_v60 = vpop.permute.xlu1 %441 }
 0x708   :  { %v438_v61 = vpop.permute.xlu0 %437 }
 0x709   :  { %v444_v62 = vsel %vm170_vm6, %v438_v61, %v442_v60 }
 0x70a   :  { %1277 = vmatmul.msk.f32.vlgmr.msrb.gmra.mxu2 %vm188_vm7, %v444_v62  ;;  %1278 = vmatmul.msk.f32.vlgmr.msrb.gmra.mxu3 %vm188_vm7, %v444_v62 }
 0x70b   :  { %840 = vmatpush.msrb.mxu2 %v1523_v25  ;;  %860 = vmatpush.msrb.mxu3 %v1528_v26  ;;  %v110_v25 = vpop.f32.mrf.mxu0 }
 0x70d   :  { %841 = vmatpush.msrb.mxu2 %v1533_v27  ;;  %861 = vmatpush.msrb.mxu3 %v1540_v28  ;;  %v111_v27 = vadd.f32 %v1511_v2, %v110_v25 }
 0x70f   :  { %842 = vmatpush.msrb.mxu2 %v1545_v29  ;;  %862 = vmatpush.msrb.mxu3 %v1550_v30 }
 0x711   :  { %843 = vmatpush.msrb.mxu2 %v1559_v31  ;;  %863 = vmatpush.msrb.mxu3 %v1564_v32 }
 0x713   :  { %844 = vmatpush.msrb.mxu2 %v1576_v34  ;;  %864 = vmatpush.msrb.mxu3 %v1581_v35 }
 0x715   :  { %845 = vmatpush.msrb.mxu2 %v1590_v36  ;;  %865 = vmatpush.msrb.mxu3 %v1595_v37 }
 0x717   :  { %846 = vmatpush.msrb.mxu2 %v1604_v38  ;;  %866 = vmatpush.msrb.mxu3 %v1609_v39 }
 0x719   :  { %847 = vmatpush.msrb.mxu2 %v1626_v42  ;;  %867 = vmatpush.msrb.mxu3 %v1631_v43 }
 0x78d   :  { %v465_v29 = vpop.f32.mrf.mxu2  ;;  %v485_v31 = vpop.f32.mrf.mxu3 }
 0x78e   :  { %v526_v34 = vadd.f32 %v465_v29, %v111_v27  ;;  %v488_v63 = vadd.f32 %v1683_v46, %v485_v31 }
 0x790   :  { %1349 = vtanh.f32 %v526_v34  ;;  %v1279_v38 = vmul.f32 -1.442695, %v488_v63  ;;  %v1280_v4 = vmul.f32 -1.442695, %v526_v34 }
 0x791   :  { %1351 = vtanh.f32 %v488_v63 }
 0x792   :  { %1353 = vpow2.f32 %v1279_v38 }
 0x796   :  { %v1350_v36 = vpop.eup %1349 }
 0x797   :  { %v1352_v0 = vpop.eup %1351  ;;  %549 = vrot.lane.b32.xlu0 %v1350_v36, %s1439_s23 }
 0x798   :  { %511 = vrot.lane.b32.xlu2 %v1352_v0, %s1439_s23  ;;  %v1354_v42 = vpop.eup %1353 }
 0x799   :  { %v492_v1 = vadd.f32 1.0, %v1354_v42 }
 0x79b   :  { %1355 = vrcp.f32 %v492_v1  ;;  %v504_v11 = vand.u32 2147483648, %v492_v1  ;;  %vm498_vm12 = vweird.f32 %v492_v1  ;;  %v502_v12 = vand.u32 2147483647, %v492_v1 }
 0x79c   :  { %1357 = vpow2.f32 %v1280_v4 }
 0x79d   :  { %v505_v14 = vor.u32 1.1754944e-38, %v504_v11  ;;  %vm503_vm14 = vcmp.eq.f32.partialorder %v502_v12, 8.507059e+37 }
 0x7a1   :  { %v1356_v3 = vpop.eup %1355 }
 0x7a2   :  { %v494_v5 = vmul.f32 %v1356_v3, %v492_v1  ;;  %v1358_v7 = vpop.eup %1357  ;;  %vm499_vm11 = vweird.f32 %v1356_v3 }
 0x7a3   :  { %v530_v9 = vadd.f32 1.0, %v1358_v7  ;;  %vm500_vm13 = vmor %vm498_vm12, %vm499_vm11 }
 0x7a4   :  { %v495_v6 = vsub.f32 1.0, %v494_v5 }
 0x7a5   :  { %1359 = vrcp.f32 %v530_v9  ;;  %v542_v24 = vand.u32 2147483648, %v530_v9  ;;  %vm536_vm0 = vweird.f32 %v530_v9  ;;  %v540_v40 = vand.u32 2147483647, %v530_v9 }
 0x7a6   :  { %v496_v8 = vmul.f32 %v1356_v3, %v495_v6 }
 0x7a7   :  { %v543_v44 = vor.u32 1.1754944e-38, %v542_v24  ;;  %vm541_vm3 = vcmp.eq.f32.partialorder %v540_v40, 8.507059e+37 }
 0x7a8   :  { %v497_v10 = vadd.f32 %v1356_v3, %v496_v8 }
 0x7aa   :  { %v501_v13 = vsel %vm500_vm13, %v1356_v3, %v497_v10 }
 0x7ab   :  { %v506_v16 = vsel %vm503_vm14, %v505_v14, %v501_v13  ;;  %v1360_v17 = vpop.eup %1359 }
 0x7ac   :  { %v532_v19 = vmul.f32 %v1360_v17, %v530_v9  ;;  %vm537_vm15 = vweird.f32 %v1360_v17  ;;  %v509_v51 = vmul.f32 %v506_v16, %v1732_v23 }
 0x7ad   :  { %vm538_vm2 = vmor %vm536_vm0, %vm537_vm15 }
 0x7ae   :  { %v533_v20 = vsub.f32 1.0, %v532_v19 }
 0x7b0   :  { %v534_v21 = vmul.f32 %v1360_v17, %v533_v20 }
 0x7b2   :  { %v535_v22 = vadd.f32 %v1360_v17, %v534_v21 }
 0x7b4   :  { %v539_v41 = vsel %vm538_vm2, %v1360_v17, %v535_v22 }
 0x7b5   :  { %v544_v48 = vsel %vm541_vm3, %v543_v44, %v539_v41 }
 0x7b6   :  { %v547_v50 = vmul.f32 %v544_v48, %v1737_v55 }
 0x7f2   :  { %v512_v15 = vpop.permute.xlu2 %511 }
 0x7f3   :  { %v514_v18 = vmul.f32 %v512_v15, %v506_v16 }
 0x7f5   :  { %516 = vrot.lane.b32.xlu1 %v514_v18, %s1440_s1 }
 0x809   :  { %v550_v47 = vpop.permute.xlu0 %549 }
 0x80a   :  { %v552_v49 = vmul.f32 %v550_v47, %v544_v48 }
 0x80c   :  { %554 = vrot.lane.b32.xlu2 %v552_v49, %s1440_s1 }
 0x866   :  { %v555_v52 = vpop.permute.xlu2 %554 }
 0x867   :  { %v517_v53 = vpop.permute.xlu1 %516  ;;  %v1774_v54 = vadd.f32 %v555_v52, %v547_v50 }
 0x868   :  { %v1776_v56 = vadd.f32 %v517_v53, %v509_v51  ;;  %v47_v53 = vld [vmem:[%s1988_s0 + $0x28] sm:$0xff] }
 0x869   :  { %1361 = vtanh.f32 %v1774_v54  ;;  %1265 = vmatmul.msk.f32.gmra.mxu0 %vm55_vm1, %v47_v53 }
 0x86a   :  { %1363 = vtanh.f32 %v1776_v56 }
 0x86f   :  { %v1362_v57 = vpop.eup %1361 }
 0x870   :  { %v1364_v33 = vpop.eup %1363  ;;  %560 = vrot.lane.b32.xlu1 %v1362_v57, %s1439_s23 }
 0x871   :  { %522 = vrot.lane.b32.xlu0 %v1364_v33, %s1439_s23 }
 0x8e2   :  { %v561_v58 = vpop.permute.xlu1 %560 }
 0x8e3   :  { %v523_v55 = vpop.permute.xlu0 %522  ;;  %v563_v59 = vmul.f32 %v561_v58, %v544_v48 }
 0x8e4   :  { %v525_v23 = vmul.f32 %v523_v55, %v506_v16 }
 0x8e5   :  { %565 = vrot.lane.b32.xlu2 %v563_v59, %s1440_s1  ;;  %v1836_v59 = vld [vmem:[%s1989_s2] ss:$0 sm:$0xff] }
 0x8e6   :  { %569 = vrot.lane.b32.xlu0 %v525_v23, %s1439_s23 }
 0x93f   :  { %v566_v60 = vpop.permute.xlu2 %565 }
 0x958   :  { %v570_v61 = vpop.permute.xlu0 %569 }
 0x959   :  { %v572_v62 = vsel %vm170_vm6, %v566_v60, %v570_v61 }
 0x95a   :  { %1281 = vmatmul.msk.f32.vlgmr.msra.gmra.mxu1 %vm188_vm7, %v572_v62  ;;  %1282 = vmatmul.msk.f32.vlgmr.msra.gmra.mxu2 %vm188_vm7, %v572_v62 }
 0x95b   :  { %988 = vmatpush.msra.mxu1 %v1528_v26  ;;  %1096 = vmatpush.msra.mxu2 %v1528_v26  ;;  %v113_v26 = vpop.f32.mrf.mxu0 }
 0x95d   :  { %989 = vmatpush.msra.mxu1 %v1540_v28  ;;  %1097 = vmatpush.msra.mxu2 %v1540_v28  ;;  %v114_v28 = vadd.f32 %v1511_v2, %v113_v26 }
 0x95f   :  { %990 = vmatpush.msra.mxu1 %v1550_v30  ;;  %1098 = vmatpush.msra.mxu2 %v1550_v30 }
 0x961   :  { %991 = vmatpush.msra.mxu1 %v1564_v32  ;;  %1099 = vmatpush.msra.mxu2 %v1564_v32 }
 0x963   :  { %992 = vmatpush.msra.mxu1 %v1581_v35  ;;  %1100 = vmatpush.msra.mxu2 %v1581_v35  ;;  %v116_v58 = vpop.f32.mrf.mxu0 }
 0x964   :  { %v117_v23 = vadd.f32 %v1836_v59, %v116_v58 }
 0x965   :  { %993 = vmatpush.msra.mxu1 %v1595_v37  ;;  %1101 = vmatpush.msra.mxu2 %v1595_v37 }
 0x967   :  { %994 = vmatpush.msra.mxu1 %v1609_v39  ;;  %1102 = vmatpush.msra.mxu2 %v1609_v39 }
 0x969   :  { %995 = vmatpush.msra.mxu1 %v1631_v43  ;;  %1103 = vmatpush.msra.mxu2 %v1631_v43 }
 0x9d7   :  { %v593_v30 = vpop.f32.mrf.mxu1 }
 0x9d8   :  { %v654_v32 = vadd.f32 %v593_v30, %v114_v28 }
 0x9da   :  { %1365 = vtanh.f32 %v654_v32  ;;  %v1284_v39 = vmul.f32 -1.442695, %v654_v32 }
 0x9dd   :  { %v613_v25 = vpop.f32.mrf.mxu2 }
 0x9de   :  { %v616_v35 = vadd.f32 %v1683_v46, %v613_v25 }
 0x9e0   :  { %v1366_v27 = vpop.eup %1365  ;;  %1367 = vtanh.f32 %v616_v35  ;;  %v1283_v34 = vmul.f32 -1.442695, %v616_v35 }
 0x9e1   :  { %677 = vrot.lane.b32.xlu2 %v1366_v27, %s1439_s23  ;;  %1369 = vpow2.f32 %v1284_v39 }
 0x9e6   :  { %v1368_v37 = vpop.eup %1367 }
 0x9e7   :  { %639 = vrot.lane.b32.xlu1 %v1368_v37, %s1439_s23  ;;  %v1370_v29 = vpop.eup %1369 }
 0x9e8   :  { %v658_v43 = vadd.f32 1.0, %v1370_v29 }
 0x9ea   :  { %1371 = vrcp.f32 %v658_v43  ;;  %v670_v38 = vand.u32 2147483648, %v658_v43  ;;  %vm664_vm5 = vweird.f32 %v658_v43  ;;  %v668_v1 = vand.u32 2147483647, %v658_v43 }
 0x9eb   :  { %1373 = vpow2.f32 %v1283_v34 }
 0x9ec   :  { %v671_v5 = vor.u32 1.1754944e-38, %v670_v38  ;;  %vm669_vm9 = vcmp.eq.f32.partialorder %v668_v1, 8.507059e+37 }
 0x9f0   :  { %v1372_v31 = vpop.eup %1371 }
 0x9f1   :  { %v660_v2 = vmul.f32 %v1372_v31, %v658_v43  ;;  %vm665_vm4 = vweird.f32 %v1372_v31  ;;  %v1374_v42 = vpop.eup %1373 }
 0x9f2   :  { %vm666_vm8 = vmor %vm664_vm5, %vm665_vm4  ;;  %v620_v4 = vadd.f32 1.0, %v1374_v42 }
 0x9f3   :  { %v661_v63 = vsub.f32 1.0, %v660_v2 }
 0x9f4   :  { %1375 = vrcp.f32 %v620_v4  ;;  %v632_v14 = vand.u32 2147483648, %v620_v4  ;;  %vm626_vm11 = vweird.f32 %v620_v4  ;;  %v630_v15 = vand.u32 2147483647, %v620_v4 }
 0x9f5   :  { %v662_v36 = vmul.f32 %v1372_v31, %v661_v63 }
 0x9f6   :  { %v633_v17 = vor.u32 1.1754944e-38, %v632_v14  ;;  %vm631_vm13 = vcmp.eq.f32.partialorder %v630_v15, 8.507059e+37 }
 0x9f7   :  { %v663_v0 = vadd.f32 %v1372_v31, %v662_v36 }
 0x9f9   :  { %v667_v3 = vsel %vm666_vm8, %v1372_v31, %v663_v0 }
 0x9fa   :  { %v672_v7 = vsel %vm669_vm9, %v671_v5, %v667_v3  ;;  %v1376_v9 = vpop.eup %1375 }
 0x9fb   :  { %v622_v10 = vmul.f32 %v1376_v9, %v620_v4  ;;  %vm627_vm10 = vweird.f32 %v1376_v9  ;;  %v675_v21 = vmul.f32 %v672_v7, %v1774_v54 }
 0x9fc   :  { %vm628_vm12 = vmor %vm626_vm11, %vm627_vm10 }
 0x9fd   :  { %v623_v11 = vsub.f32 1.0, %v622_v10 }
 0x9ff   :  { %v624_v12 = vmul.f32 %v1376_v9, %v623_v11 }
 0xa01   :  { %v625_v13 = vadd.f32 %v1376_v9, %v624_v12 }
 0xa03   :  { %v629_v16 = vsel %vm628_vm12, %v1376_v9, %v625_v13 }
 0xa04   :  { %v634_v19 = vsel %vm631_vm13, %v633_v17, %v629_v16 }
 0xa05   :  { %v637_v41 = vmul.f32 %v634_v19, %v1776_v56 }
 0xa3b   :  { %v678_v6 = vpop.permute.xlu2 %677 }
 0xa3c   :  { %v680_v8 = vmul.f32 %v678_v6, %v672_v7 }
 0xa3e   :  { %682 = vrot.lane.b32.xlu1 %v680_v8, %s1440_s1 }
 0xa59   :  { %v640_v18 = vpop.permute.xlu1 %639 }
 0xa5a   :  { %v642_v20 = vmul.f32 %v640_v18, %v634_v19 }
 0xa5c   :  { %644 = vrot.lane.b32.xlu0 %v642_v20, %s1440_s1 }
 0xab0   :  { %v683_v22 = vpop.permute.xlu1 %682 }
 0xab1   :  { %v1814_v24 = vadd.f32 %v683_v22, %v675_v21 }
 0xab3   :  { %1377 = vtanh.f32 %v1814_v24 }
 0xab9   :  { %v1378_v40 = vpop.eup %1377 }
 0xaba   :  { %688 = vrot.lane.b32.xlu0 %v1378_v40, %s1439_s23 }
 0xace   :  { %v645_v44 = vpop.permute.xlu0 %644 }
 0xacf   :  { %v1819_v47 = vadd.f32 %v645_v44, %v637_v41 }
 0xad1   :  { %1379 = vtanh.f32 %v1819_v47 }
 0xad7   :  { %v1380_v48 = vpop.eup %1379 }
 0xad8   :  { %650 = vrot.lane.b32.xlu2 %v1380_v48, %s1439_s23 }
 0xb2c   :  { %v689_v49 = vpop.permute.xlu0 %688 }
 0xb2d   :  { %v691_v50 = vmul.f32 %v689_v49, %v672_v7 }
 0xb2f   :  { %693 = vrot.lane.b32.xlu1 %v691_v50, %s1440_s1 }
 0xb32   :  { %v651_v51 = vpop.permute.xlu2 %650 }
 0xb33   :  { %v653_v52 = vmul.f32 %v651_v51, %v634_v19 }
 0xb35   :  { %697 = vrot.lane.b32.xlu2 %v653_v52, %s1439_s23 }
 0xb8f   :  { %v698_v54 = vpop.permute.xlu2 %697 }
 0xba1   :  { %v694_v56 = vpop.permute.xlu1 %693 }
 0xba2   :  { %v700_v57 = vsel %vm170_vm6, %v694_v56, %v698_v54 }
 0xba3   :  { %1285 = vmatmul.msk.f32.vlgmr.msra.gmra.mxu3 %vm188_vm7, %v700_v57  ;;  %1286 = vmatmul.msk.f32.vlgmr.msrb.gmra.mxu1 %vm188_vm7, %v700_v57 }
 0xc20   :  { %v741_v33 = vpop.f32.mrf.mxu1 }
 0xc21   :  { %v744_v55 = vadd.f32 %v1683_v46, %v741_v33 }
 0xc23   :  { %1381 = vtanh.f32 %v744_v55  ;;  %v1287_v26 = vmul.f32 -1.442695, %v744_v55 }
 0xc26   :  { %v721_v45 = vpop.f32.mrf.mxu3 }
 0xc27   :  { %v782_v60 = vadd.f32 %v721_v45, %v117_v23 }
 0xc29   :  { %v1382_v61 = vpop.eup %1381  ;;  %1383 = vtanh.f32 %v782_v60  ;;  %v1288_v28 = vmul.f32 -1.442695, %v782_v60 }
 0xc2a   :  { %767 = vrot.lane.b32.xlu0 %v1382_v61, %s1439_s23  ;;  %1385 = vpow2.f32 %v1287_v26 }
 0xc2b   :  { %1387 = vpow2.f32 %v1288_v28 }
 0xc2f   :  { %v1384_v62 = vpop.eup %1383 }
 0xc30   :  { %805 = vrot.lane.b32.xlu1 %v1384_v62, %s1439_s23  ;;  %v1386_v30 = vpop.eup %1385 }
 0xc31   :  { %v748_v32 = vadd.f32 1.0, %v1386_v30  ;;  %v1388_v25 = vpop.eup %1387 }
 0xc32   :  { %v786_v35 = vadd.f32 1.0, %v1388_v25 }
 0xc33   :  { %1389 = vrcp.f32 %v748_v32  ;;  %v760_v63 = vand.u32 2147483648, %v748_v32  ;;  %vm754_vm15 = vweird.f32 %v748_v32  ;;  %v758_v36 = vand.u32 2147483647, %v748_v32 }
 0xc34   :  { %1391 = vrcp.f32 %v786_v35  ;;  %v798_v5 = vand.u32 2147483648, %v786_v35  ;;  %vm792_vm4 = vweird.f32 %v786_v35  ;;  %v796_v7 = vand.u32 2147483647, %v786_v35 }
 0xc35   :  { %v761_v42 = vor.u32 1.1754944e-38, %v760_v63  ;;  %vm759_vm2 = vcmp.eq.f32.partialorder %v758_v36, 8.507059e+37 }
 0xc36   :  { %v799_v9 = vor.u32 1.1754944e-38, %v798_v5  ;;  %vm797_vm8 = vcmp.eq.f32.partialorder %v796_v7, 8.507059e+37 }
 0xc39   :  { %v1390_v27 = vpop.eup %1389 }
 0xc3a   :  { %v750_v37 = vmul.f32 %v1390_v27, %v748_v32  ;;  %v1392_v39 = vpop.eup %1391  ;;  %vm755_vm14 = vweird.f32 %v1390_v27 }
 0xc3b   :  { %v788_v43 = vmul.f32 %v1392_v39, %v786_v35  ;;  %vm756_vm0 = vmor %vm754_vm15, %vm755_vm14  ;;  %vm793_vm3 = vweird.f32 %v1392_v39 }
 0xc3c   :  { %v751_v29 = vsub.f32 1.0, %v750_v37  ;;  %vm794_vm5 = vmor %vm792_vm4, %vm793_vm3 }
 0xc3d   :  { %v789_v2 = vsub.f32 1.0, %v788_v43 }
 0xc3e   :  { %v752_v31 = vmul.f32 %v1390_v27, %v751_v29 }
 0xc3f   :  { %v790_v0 = vmul.f32 %v1392_v39, %v789_v2 }
 0xc40   :  { %v753_v34 = vadd.f32 %v1390_v27, %v752_v31 }
 0xc41   :  { %v791_v1 = vadd.f32 %v1392_v39, %v790_v0 }
 0xc42   :  { %v757_v38 = vsel %vm756_vm0, %v1390_v27, %v753_v34 }
 0xc43   :  { %v762_v4 = vsel %vm759_vm2, %v761_v42, %v757_v38  ;;  %v795_v8 = vsel %vm794_vm5, %v1392_v39, %v791_v1 }
 0xc44   :  { %v800_v11 = vsel %vm797_vm8, %v799_v9, %v795_v8  ;;  %v765_v13 = vmul.f32 %v762_v4, %v1819_v47 }
 0xc45   :  { %v803_v17 = vmul.f32 %v800_v11, %v1814_v24  ;;  %v48_v24 = vld [vmem:[%s1988_s0 + $0x30] sm:$0xff] }
 0xc46   :  { %1266 = vmatmul.msk.f32.gmra.mxu0 %vm55_vm1, %v48_v24  ;;  %v1891_v24 = vld [vmem:[%s1991_s4] ss:$0 sm:$0xff] }
 0xc9c   :  { %v768_v3 = vpop.permute.xlu0 %767 }
 0xc9d   :  { %v770_v6 = vmul.f32 %v768_v3, %v762_v4 }
 0xc9f   :  { %772 = vrot.lane.b32.xlu2 %v770_v6, %s1440_s1 }
 0xca2   :  { %v806_v10 = vpop.permute.xlu1 %805 }
 0xca3   :  { %v808_v12 = vmul.f32 %v806_v10, %v800_v11 }
 0xca5   :  { %810 = vrot.lane.b32.xlu0 %v808_v12, %s1440_s1 }
 0xcc3   :  { %v119_v49 = vpop.f32.mrf.mxu0 }
 0xcc4   :  { %v120_v50 = vadd.f32 %v1836_v59, %v119_v49 }
 0xcf9   :  { %v773_v14 = vpop.permute.xlu2 %772 }
 0xcfa   :  { %v1844_v15 = vadd.f32 %v773_v14, %v765_v13 }
 0xcfc   :  { %1393 = vtanh.f32 %v1844_v15 }
 0xd02   :  { %v1394_v16 = vpop.eup %1393 }
 0xd03   :  { %778 = vrot.lane.b32.xlu1 %v1394_v16, %s1439_s23  ;;  %v49_v16 = vld [vmem:[%s1988_s0 + $0x38] sm:$0xff] }
 0xd04   :  { %1267 = vmatmul.msk.f32.gmra.mxu0 %vm55_vm1, %v49_v16 }
 0xd17   :  { %v811_v18 = vpop.permute.xlu0 %810 }
 0xd18   :  { %v1849_v19 = vadd.f32 %v811_v18, %v803_v17 }
 0xd1a   :  { %1395 = vtanh.f32 %v1849_v19 }
 0xd20   :  { %v1396_v20 = vpop.eup %1395 }
 0xd21   :  { %816 = vrot.lane.b32.xlu2 %v1396_v20, %s1439_s23 }
 0xd75   :  { %v779_v21 = vpop.permute.xlu1 %778 }
 0xd76   :  { %v781_v22 = vmul.f32 %v779_v21, %v762_v4 }
 0xd78   :  { %825 = vrot.lane.b32.xlu1 %v781_v22, %s1439_s23 }
 0xd7b   :  { %v817_v40 = vpop.permute.xlu2 %816 }
 0xd7c   :  { %v819_v41 = vmul.f32 %v817_v40, %v800_v11 }
 0xd7e   :  { %821 = vrot.lane.b32.xlu0 %v819_v41, %s1440_s1 }
 0xd81   :  { %v122_v20 = vpop.f32.mrf.mxu0 }
 0xd82   :  { %v123_v21 = vadd.f32 %v1836_v59, %v122_v20 }
 0xdea   :  { %v826_v44 = vpop.permute.xlu1 %825 }
 0xdf0   :  { %v822_v47 = vpop.permute.xlu0 %821 }
 0xdf1   :  { %v828_v48 = vsel %vm170_vm6, %v822_v47, %v826_v44 }
 0xdf2   :  { %1289 = vmatmul.msk.f32.vlgmr.msrb.gmra.mxu2 %vm188_vm7, %v828_v48  ;;  %1290 = vmatmul.msk.f32.vlgmr.msrb.gmra.mxu3 %vm188_vm7, %v828_v48 }
 0xe75   :  { %v849_v51 = vpop.f32.mrf.mxu2  ;;  %v869_v52 = vpop.f32.mrf.mxu3 }
 0xe76   :  { %v910_v53 = vadd.f32 %v849_v51, %v120_v50  ;;  %v872_v54 = vadd.f32 %v1683_v46, %v869_v52 }
 0xe78   :  { %1397 = vtanh.f32 %v910_v53  ;;  %v1291_v33 = vmul.f32 -1.442695, %v872_v54  ;;  %v1292_v45 = vmul.f32 -1.442695, %v910_v53 }
 0xe79   :  { %1399 = vtanh.f32 %v872_v54 }
 0xe7a   :  { %1401 = vpow2.f32 %v1291_v33 }
 0xe7e   :  { %v1398_v56 = vpop.eup %1397 }
 0xe7f   :  { %v1400_v57 = vpop.eup %1399  ;;  %933 = vrot.lane.b32.xlu0 %v1398_v56, %s1439_s23 }
 0xe80   :  { %895 = vrot.lane.b32.xlu2 %v1400_v57, %s1439_s23  ;;  %v1402_v58 = vpop.eup %1401 }
 0xe81   :  { %v876_v55 = vadd.f32 1.0, %v1402_v58 }
 0xe83   :  { %1403 = vrcp.f32 %v876_v55  ;;  %v888_v30 = vand.u32 2147483648, %v876_v55  ;;  %vm882_vm10 = vweird.f32 %v876_v55  ;;  %v886_v32 = vand.u32 2147483647, %v876_v55 }
 0xe84   :  { %1405 = vpow2.f32 %v1292_v45 }
 0xe85   :  { %v889_v35 = vor.u32 1.1754944e-38, %v888_v30  ;;  %vm887_vm12 = vcmp.eq.f32.partialorder %v886_v32, 8.507059e+37 }
 0xe89   :  { %v1404_v23 = vpop.eup %1403 }
 0xe8a   :  { %v878_v60 = vmul.f32 %v1404_v23, %v876_v55  ;;  %v1406_v62 = vpop.eup %1405  ;;  %vm883_vm9 = vweird.f32 %v1404_v23 }
 0xe8b   :  { %v914_v26 = vadd.f32 1.0, %v1406_v62  ;;  %vm884_vm11 = vmor %vm882_vm10, %vm883_vm9 }
 0xe8c   :  { %v879_v61 = vsub.f32 1.0, %v878_v60 }
 0xe8d   :  { %1407 = vrcp.f32 %v914_v26  ;;  %v926_v63 = vand.u32 2147483648, %v914_v26  ;;  %vm920_vm14 = vweird.f32 %v914_v26  ;;  %v924_v36 = vand.u32 2147483647, %v914_v26 }
 0xe8e   :  { %v880_v46 = vmul.f32 %v1404_v23, %v879_v61 }
 0xe8f   :  { %v927_v38 = vor.u32 1.1754944e-38, %v926_v63  ;;  %vm925_vm0 = vcmp.eq.f32.partialorder %v924_v36, 8.507059e+37 }
 0xe90   :  { %v881_v28 = vadd.f32 %v1404_v23, %v880_v46 }
 0xe92   :  { %v885_v25 = vsel %vm884_vm11, %v1404_v23, %v881_v28 }
 0xe93   :  { %v890_v37 = vsel %vm887_vm12, %v889_v35, %v885_v25  ;;  %v1408_v39 = vpop.eup %1407 }
 0xe94   :  { %v916_v43 = vmul.f32 %v1408_v39, %v914_v26  ;;  %vm921_vm13 = vweird.f32 %v1408_v39  ;;  %v893_v5 = vmul.f32 %v890_v37, %v1844_v15 }
 0xe95   :  { %vm922_vm15 = vmor %vm920_vm14, %vm921_vm13 }
 0xe96   :  { %v917_v31 = vsub.f32 1.0, %v916_v43 }
 0xe98   :  { %v918_v2 = vmul.f32 %v1408_v39, %v917_v31 }
 0xe9a   :  { %v919_v34 = vadd.f32 %v1408_v39, %v918_v2 }
 0xe9c   :  { %v923_v0 = vsel %vm922_vm15, %v1408_v39, %v919_v34 }
 0xe9d   :  { %v928_v1 = vsel %vm925_vm0, %v927_v38, %v923_v0 }
 0xe9e   :  { %v931_v4 = vmul.f32 %v928_v1, %v1849_v19 }
 0xeda   :  { %v896_v27 = vpop.permute.xlu2 %895 }
 0xedb   :  { %v898_v29 = vmul.f32 %v896_v27, %v890_v37 }
 0xedd   :  { %900 = vrot.lane.b32.xlu1 %v898_v29, %s1440_s1 }
 0xef1   :  { %v934_v42 = vpop.permute.xlu0 %933 }
 0xef2   :  { %v936_v3 = vmul.f32 %v934_v42, %v928_v1 }
 0xef4   :  { %938 = vrot.lane.b32.xlu2 %v936_v3, %s1440_s1 }
 0xf4e   :  { %v939_v6 = vpop.permute.xlu2 %938 }
 0xf4f   :  { %v901_v7 = vpop.permute.xlu1 %900  ;;  %v1870_v8 = vadd.f32 %v939_v6, %v931_v4 }
 0xf50   :  { %v1872_v9 = vadd.f32 %v901_v7, %v893_v5 }
 0xf51   :  { %1409 = vtanh.f32 %v1870_v8 }
 0xf52   :  { %1411 = vtanh.f32 %v1872_v9 }
 0xf57   :  { %v1410_v10 = vpop.eup %1409 }
 0xf58   :  { %v1412_v11 = vpop.eup %1411  ;;  %944 = vrot.lane.b32.xlu1 %v1410_v10, %s1439_s23 }
 0xf59   :  { %906 = vrot.lane.b32.xlu0 %v1412_v11, %s1439_s23 }
 0xfca   :  { %v945_v12 = vpop.permute.xlu1 %944 }
 0xfcb   :  { %v907_v13 = vpop.permute.xlu0 %906  ;;  %v947_v14 = vmul.f32 %v945_v12, %v928_v1 }
 0xfcc   :  { %v909_v15 = vmul.f32 %v907_v13, %v890_v37 }
 0xfcd   :  { %949 = vrot.lane.b32.xlu2 %v947_v14, %s1440_s1 }
 0xfce   :  { %953 = vrot.lane.b32.xlu0 %v909_v15, %s1439_s23 }
0x1027   :  { %v950_v17 = vpop.permute.xlu2 %949 }
0x1040   :  { %v954_v18 = vpop.permute.xlu0 %953 }
0x1041   :  { %v956_v19 = vsel %vm170_vm6, %v950_v17, %v954_v18 }
0x1042   :  { %1293 = vmatmul.msk.f32.vlgmr.msrb.gmra.mxu0 %vm188_vm7, %v956_v19  ;;  %1294 = vmatmul.msk.f32.vlgmr.msra.gmra.mxu1 %vm188_vm7, %v956_v19 }
0x10bf   :  { %v977_v22 = vpop.f32.mrf.mxu0  ;;  %v997_v40 = vpop.f32.mrf.mxu1 }
0x10c0   :  { %v1038_v41 = vadd.f32 %v977_v22, %v123_v21  ;;  %v1000_v44 = vadd.f32 %v1891_v24, %v997_v40 }
0x10c2   :  { %1413 = vtanh.f32 %v1038_v41  ;;  %v1296_v49 = vmul.f32 -1.442695, %v1038_v41  ;;  %v1295_v52 = vmul.f32 -1.442695, %v1000_v44 }
0x10c3   :  { %1415 = vtanh.f32 %v1000_v44 }
0x10c4   :  { %1417 = vpow2.f32 %v1296_v49 }
0x10c8   :  { %v1414_v47 = vpop.eup %1413 }
0x10c9   :  { %v1416_v48 = vpop.eup %1415  ;;  %1061 = vrot.lane.b32.xlu2 %v1414_v47, %s1439_s23 }
0x10ca   :  { %1023 = vrot.lane.b32.xlu1 %v1416_v48, %s1439_s23  ;;  %v1418_v59 = vpop.eup %1417 }
0x10cb   :  { %v1042_v50 = vadd.f32 1.0, %v1418_v59 }
0x10cd   :  { %1419 = vrcp.f32 %v1042_v50  ;;  %v1054_v55 = vand.u32 2147483648, %v1042_v50  ;;  %vm1048_vm2 = vweird.f32 %v1042_v50  ;;  %v1052_v23 = vand.u32 2147483647, %v1042_v50 }
0x10ce   :  { %1421 = vpow2.f32 %v1295_v52  ;;  %v1148_v52 = vld [vmem:[%s1992_s5 + $0x10] sm:$0xff] }
0x10cf   :  { %v1055_v60 = vor.u32 1.1754944e-38, %v1054_v55  ;;  %vm1053_vm4 = vcmp.eq.f32.partialorder %v1052_v23, 8.507059e+37  ;;  %v1185_v55 = vld [vmem:[%s1994_s7 + $0x28] sm:$0xff]  ;;  %v1184_v23 = vld [vmem:[%s1994_s7 + $0x20] sm:$0xff] }
0x10d3   :  { %v1420_v51 = vpop.eup %1419 }
0x10d4   :  { %v1044_v53 = vmul.f32 %v1420_v51, %v1042_v50  ;;  %v1422_v57 = vpop.eup %1421  ;;  %vm1049_vm1 = vweird.f32 %v1420_v51 }
0x10d5   :  { %v1004_v33 = vadd.f32 1.0, %v1422_v57  ;;  %vm1050_vm3 = vmor %vm1048_vm2, %vm1049_vm1 }
0x10d6   :  { %v1045_v54 = vsub.f32 1.0, %v1044_v53  ;;  %v1147_v53 = vld [vmem:[%s1992_s5 + $0x8] sm:$0xff] }
0x10d7   :  { %1423 = vrcp.f32 %v1004_v33  ;;  %v1016_v35 = vand.u32 2147483648, %v1004_v33  ;;  %vm1010_vm8 = vweird.f32 %v1004_v33  ;;  %v1014_v27 = vand.u32 2147483647, %v1004_v33 }
0x10d8   :  { %v1046_v56 = vmul.f32 %v1420_v51, %v1045_v54  ;;  %v1146_v54 = vld [vmem:[%s1992_s5] sm:$0xff] }
0x10d9   :  { %v1017_v39 = vor.u32 1.1754944e-38, %v1016_v35  ;;  %vm1015_vm10 = vcmp.eq.f32.partialorder %v1014_v27, 8.507059e+37  ;;  %v1224_v35 = vld [vmem:[%s1996_s9 + $0x30] sm:$0xff]  ;;  %v1223_v27 = vld [vmem:[%s1996_s9 + $0x28] sm:$0xff] }
0x10da   :  { %v1047_v58 = vadd.f32 %v1420_v51, %v1046_v56 }
0x10dc   :  { %v1051_v45 = vsel %vm1050_vm3, %v1420_v51, %v1047_v58  ;;  %v1149_v51 = vld [vmem:[%s1992_s5 + $0x18] sm:$0xff]  ;;  %v1186_v58 = vld [vmem:[%s1994_s7 + $0x30] sm:$0xff] }
0x10dd   :  { %v1056_v62 = vsel %vm1053_vm4, %v1055_v60, %v1051_v45  ;;  %v1424_v26 = vpop.eup %1423  ;;  %1171 = vmatpush.msra.mxu3 %v1149_v51  ;;  %v1183_v45 = vld [vmem:[%s1994_s7 + $0x18] sm:$0xff] }
0x10de   :  { %v1006_v28 = vmul.f32 %v1424_v26, %v1004_v33  ;;  %vm1011_vm5 = vweird.f32 %v1424_v26  ;;  %v1059_v2 = vmul.f32 %v1056_v62, %v1870_v8  ;;  %v1187_v33 = vld [vmem:[%s1994_s7 + $0x38] sm:$0xff] }
0x10df   :  { %vm1012_vm9 = vmor %vm1010_vm8, %vm1011_vm5  ;;  %1172 = vmatpush.msra.mxu3 %v1148_v52  ;;  %1203 = vmatpush.msra.mxu0 %v1187_v33 }
0x10e0   :  { %v1007_v30 = vsub.f32 1.0, %v1006_v28  ;;  %v1306_v28 = vld [vmem:[%s1993_s6] ss:$0 sm:$0xff] }
0x10e1   :  { %1173 = vmatpush.msra.mxu3 %v1147_v53  ;;  %1204 = vmatpush.msra.mxu0 %v1186_v58 }
0x10e2   :  { %v1008_v32 = vmul.f32 %v1424_v26, %v1007_v30 }
0x10e3   :  { %1174 = vmatpush.msra.mxu3 %v1146_v54  ;;  %1205 = vmatpush.msra.mxu0 %v1185_v55 }
0x10e4   :  { %v1009_v25 = vadd.f32 %v1424_v26, %v1008_v32 }
0x10e5   :  { %1206 = vmatpush.msra.mxu0 %v1184_v23 }
0x10e6   :  { %v1013_v37 = vsel %vm1012_vm9, %v1424_v26, %v1009_v25  ;;  %v1225_v26 = vld [vmem:[%s1996_s9 + $0x38] sm:$0xff] }
0x10e7   :  { %v1018_v43 = vsel %vm1015_vm10, %v1017_v39, %v1013_v37  ;;  %1207 = vmatpush.msra.mxu0 %v1183_v45  ;;  %1242 = vmatpush.msrb.mxu3 %v1225_v26  ;;  %v1222_v37 = vld [vmem:[%s1996_s9 + $0x20] sm:$0xff]  ;;  %v1221_v39 = vld [vmem:[%s1996_s9 + $0x18] sm:$0xff] }
0x10e8   :  { %v1021_v0 = vmul.f32 %v1018_v43, %v1872_v9 }
0x10e9   :  { %1243 = vmatpush.msrb.mxu3 %v1224_v35 }
0x10eb   :  { %1244 = vmatpush.msrb.mxu3 %v1223_v27 }
0x10ed   :  { %1245 = vmatpush.msrb.mxu3 %v1222_v37 }
0x10ef   :  { %1246 = vmatpush.msrb.mxu3 %v1221_v39 }
0x1123   :  { %v1062_v61 = vpop.permute.xlu2 %1061 }
0x1124   :  { %v1064_v46 = vmul.f32 %v1062_v61, %v1056_v62  ;;  %v1182_v61 = vld [vmem:[%s1994_s7 + $0x10] sm:$0xff] }
0x1125   :  { %1208 = vmatpush.msra.mxu0 %v1182_v61 }
0x1126   :  { %1066 = vrot.lane.b32.xlu1 %v1064_v46, %s1440_s1  ;;  %v1180_v46 = vld [vmem:[%s1994_s7] sm:$0xff] }
0x113c   :  { %v1024_v29 = vpop.permute.xlu1 %1023 }
0x113d   :  { %v1026_v31 = vmul.f32 %v1024_v29, %v1018_v43  ;;  %v1220_v29 = vld [vmem:[%s1996_s9 + $0x10] sm:$0xff] }
0x113e   :  { %1247 = vmatpush.msrb.mxu3 %v1220_v29 }
0x113f   :  { %1028 = vrot.lane.b32.xlu0 %v1026_v31, %s1440_s1  ;;  %v1218_v31 = vld [vmem:[%s1996_s9] sm:$0xff] }
0x1198   :  { %v1067_v34 = vpop.permute.xlu1 %1066 }
0x1199   :  { %v1069_v63 = vadd.f32 %v1067_v34, %v1059_v2  ;;  %v1307_v2 = vld [vmem:[%s1995_s8] ss:$0 sm:$0xff] }
0x119b   :  { %1425 = vtanh.f32 %v1069_v63 }
0x11a1   :  { %v1426_v36 = vpop.eup %1425 }
0x11a2   :  { %1072 = vrot.lane.b32.xlu0 %v1426_v36, %s1439_s23 }
0x11b1   :  { %v1029_v38 = vpop.permute.xlu0 %1028 }
0x11b2   :  { %v1031_v42 = vadd.f32 %v1029_v38, %v1021_v0  ;;  %v1308_v38 = vld [vmem:[%s1997_s10] ss:$0 sm:$0xff] }
0x11b4   :  { %1427 = vtanh.f32 %v1031_v42 }
0x11ba   :  { %v1428_v1 = vpop.eup %1427 }
0x11bb   :  { %1034 = vrot.lane.b32.xlu2 %v1428_v1, %s1439_s23 }
0x1214   :  { %v1073_v3 = vpop.permute.xlu0 %1072 }
0x1215   :  { %v1035_v4 = vpop.permute.xlu2 %1034  ;;  %v1075_v5 = vmul.f32 %v1073_v3, %v1056_v62  ;;  %v1181_v62 = vld [vmem:[%s1994_s7 + $0x8] sm:$0xff] }
0x1216   :  { %v1037_v6 = vmul.f32 %v1035_v4, %v1018_v43  ;;  %1209 = vmatpush.msra.mxu0 %v1181_v62  ;;  %v1219_v43 = vld [vmem:[%s1996_s9 + $0x8] sm:$0xff] }
0x1217   :  { %1077 = vrot.lane.b32.xlu1 %v1075_v5, %s1440_s1  ;;  %1248 = vmatpush.msrb.mxu3 %v1219_v43 }
0x1218   :  { %1081 = vrot.lane.b32.xlu2 %v1037_v6, %s1439_s23  ;;  %1210 = vmatpush.msra.mxu0 %v1180_v46 }
0x1219   :  { %1249 = vmatpush.msrb.mxu3 %v1218_v31 }
0x1272   :  { %v1082_v7 = vpop.permute.xlu2 %1081 }
0x1289   :  { %v1078_v8 = vpop.permute.xlu1 %1077 }
0x128a   :  { %v1084_v10 = vsel %vm170_vm6, %v1078_v8, %v1082_v7 }
0x128b   :  { %1297 = vmatmul.msk.f32.vlgmr.msra.gmra.mxu2 %vm188_vm7, %v1084_v10 }
0x130e   :  { %v1105_v9 = vpop.f32.mrf.mxu2 }
0x130f   :  { %v1108_v11 = vadd.f32 %v1891_v24, %v1105_v9 }
0x1311   :  { %1429 = vtanh.f32 %v1108_v11  ;;  %v1298_v13 = vmul.f32 -1.442695, %v1108_v11 }
0x1313   :  { %1431 = vpow2.f32 %v1298_v13 }
0x1317   :  { %v1430_v12 = vpop.eup %1429 }
0x1318   :  { %1131 = vrot.lane.b32.xlu0 %v1430_v12, %s1439_s23 }
0x1319   :  { %v1432_v14 = vpop.eup %1431 }
0x131a   :  { %v1112_v15 = vadd.f32 1.0, %v1432_v14 }
0x131c   :  { %1433 = vrcp.f32 %v1112_v15  ;;  %v1124_v21 = vand.u32 2147483648, %v1112_v15  ;;  %vm1118_vm12 = vweird.f32 %v1112_v15  ;;  %v1122_v22 = vand.u32 2147483647, %v1112_v15 }
0x131e   :  { %v1125_v41 = vor.u32 1.1754944e-38, %v1124_v21  ;;  %vm1123_vm14 = vcmp.eq.f32.partialorder %v1122_v22, 8.507059e+37 }
0x1322   :  { %v1434_v16 = vpop.eup %1433 }
0x1323   :  { %v1114_v17 = vmul.f32 %v1434_v16, %v1112_v15  ;;  %vm1119_vm11 = vweird.f32 %v1434_v16 }
0x1324   :  { %vm1120_vm13 = vmor %vm1118_vm12, %vm1119_vm11 }
0x1325   :  { %v1115_v18 = vsub.f32 1.0, %v1114_v17 }
0x1327   :  { %v1116_v19 = vmul.f32 %v1434_v16, %v1115_v18 }
0x1329   :  { %v1117_v20 = vadd.f32 %v1434_v16, %v1116_v19 }
0x132b   :  { %v1121_v40 = vsel %vm1120_vm13, %v1434_v16, %v1117_v20 }
0x132c   :  { %v1126_v44 = vsel %vm1123_vm14, %v1125_v41, %v1121_v40 }
0x132d   :  { %v1129_v48 = vmul.f32 %v1126_v44, %v1031_v42 }
0x138a   :  { %v1132_v24 = vpop.permute.xlu0 %1131 }
0x138b   :  { %v1134_v47 = vmul.f32 %v1132_v24, %v1126_v44 }
0x138d   :  { %1136 = vrot.lane.b32.xlu1 %v1134_v47, %s1440_s1 }
0x13ff   :  { %v1137_v49 = vpop.permute.xlu1 %1136 }
0x1400   :  { %v1139_v59 = vadd.f32 %v1137_v49, %v1129_v48 }
0x1402   :  { %1435 = vtanh.f32 %v1139_v59 }
0x1408   :  { %v1436_v50 = vpop.eup %1435 }
0x1409   :  { %1142 = vrot.lane.b32.xlu2 %v1436_v50, %s1439_s23 }
0x1463   :  { %v1143_v56 = vpop.permute.xlu2 %1142 }
0x1464   :  { %v1145_v57 = vmul.f32 %v1143_v56, %v1126_v44 }
0x1466   :  { %1155 = vrot.lane.b32.xlu0 %v1145_v57, %s1440_s1 }
0x14d8   :  { %v1156_v60 = vpop.permute.xlu0 %1155 }
0x14d9   :  { %1299 = vmatmul.msk.f32.vlgmr.msra.gmra.mxu3 %vm170_vm6, %v1156_v60 }
0x155c   :  { %v1176_v30 = vpop.f32.mrf.mxu3 }
0x155d   :  { %v1177_v32 = vadd.f32 %v1306_v28, %v1176_v30 }
0x155f   :  { %v1179_v25 = vmax.f32 %v1177_v32, 0.0 }
0x1561   :  { %1300 = vmatmul.msk.f32.vlgmr.msra.gmra.mxu0 %vm188_vm7, %v1179_v25 }
0x15de   :  { %v1212_v34 = vpop.f32.mrf.mxu0 }
0x15df   :  { %v1213_v63 = vadd.f32 %v1307_v2, %v1212_v34 }
0x15e1   :  { %v1215_v36 = vmax.f32 %v1213_v63, 0.0 }
0x15e3   :  { %1216 = vst.msk [vmem:[#allocation2] sm:$0xff] %vm188_vm7, %v1215_v36 }
0x15ea   :  { %v1217_v0 = vld [vmem:[#allocation2] sm:$0xff] }
0x15eb   :  { %1301 = vmatmul.msk.f32.vlgmr.msrb.gmra.mxu3 %vm188_vm7, %v1217_v0 }
0x166e   :  { %v1251_v42 = vpop.f32.mrf.mxu3 }
0x166f   :  { %v1252_v1 = vadd.f32 %v1308_v38, %v1251_v42 }
0x1671   :  { %1254 = vst [vmem:[%s1998_s11] sm:$0xff] %v1252_v1 }

</bundles_post_ra>
